<compile_context>
chip_gen: v5e
topology: v5e:2x2
jax: 0.10.0
libtpu: 0.0.40
codegen_flags: <defaults>
</compile_context>

<pallas_src>
import functools

import jax
import jax.numpy as jnp
from jax.experimental import pallas as pl
from jax.experimental.pallas import tpu as pltpu


def _round_up(x, m):
    return (x + m - 1) // m * m


def _vmem_bytes(shape, dtype):
    """Rough VMEM footprint of a block: (8,128) tiling on the last two dims."""
    shape = tuple(int(d) for d in shape)
    if len(shape) < 2:
        shape = (1,) * (2 - len(shape)) + shape
    lead = 1
    for d in shape[:-2]:
        lead *= d
    sub = _round_up(shape[-2], 8)
    lane = _round_up(shape[-1], 128)
    return lead * sub * lane * jnp.dtype(dtype).itemsize


def _sepconv_kernel(x_ref, dww_ref, dwb_ref, pww_ref, pwb_ref, o_ref, acc_ref,
                    *, matmul_dtype):
    """One (batch, row-tile) grid step.

    x_ref  : (TH+K-1, Wp, Cin)   halo'd, spatially padded input row tile
    dww_ref: (K*K, Cin)          depthwise filter taps
    dwb_ref: (1, Cin)            depthwise bias
    pww_ref: (Cin, Cout)         pointwise (1x1) filter
    pwb_ref: (1, Cout)           pointwise bias
    o_ref  : (TH, Wo, Cout)      output row tile
    acc_ref: (TH, Wo, Cin) f32   VMEM scratch accumulator
    """
    TH, Wo, Cout = o_ref.shape
    THK, Wp, Cin = x_ref.shape
    K = THK - TH + 1

    # Hoist the (tiny) depthwise weight load out of the tap loop.
    dww = dww_ref[...].astype(jnp.float32)                  # (K*K, Cin)

    # Depthwise conv: K*K shifted-window FMAs accumulated in VMEM scratch.
    # Windows are sliced straight from the ref -> offset vector loads.
    for kh in range(K):
        for kw in range(K):
            win = x_ref[pl.ds(kh, TH), pl.ds(kw, Wo), :].astype(jnp.float32)
            tap = win * dww[kh * K + kw][None, None, :]
            if kh == 0 and kw == 0:
                acc_ref[...] = tap
            else:
                acc_ref[...] += tap

    # Bias + ReLU, in place in the scratch.
    bias = dwb_ref[0].astype(jnp.float32)
    acc_ref[...] = jnp.maximum(acc_ref[...] + bias[None, None, :], 0.0)

    # Pointwise 1x1 conv == matmul over channels (MXU).  Wo is padded to a
    # multiple of 8 by the wrapper so this reshape is layout-free.
    a2d = acc_ref[...].reshape(TH * Wo, Cin).astype(matmul_dtype)
    y = jnp.dot(a2d, pww_ref[...].astype(matmul_dtype),
                preferred_element_type=jnp.float32)          # (TH*Wo, Cout)
    y = y + pwb_ref[0].astype(jnp.float32)[None, :]
    o_ref[...] = y.reshape(TH, Wo, Cout).astype(o_ref.dtype)


def sep_conv2d(x_nchw, dw_w, dw_b, pw_w, pw_b, *,
               kernel_size=3, stride=1, padding=1, dilation=1,
               row_tile=None, matmul_dtype=jnp.float32,
               vmem_budget_bytes=32 * 1024 * 1024):
    """SepConv2d forward. x_nchw: (N, Cin, H, W). Returns (N, Cout, Ho, Wo)."""
    # TODO(synk): stride>1 / dilation>1 variants of the depthwise window loop.
    assert stride == 1 and dilation == 1, "kernel implemented for stride=1, dilation=1"
    N, Cin, H, W = x_nchw.shape
    K = kernel_size
    Cout = pw_w.shape[1]
    Ho = H + 2 * padding - K + 1
    Wo = W + 2 * padding - K + 1
    assert Ho > 0 and Wo > 0

    # Output geometry: Wo padded to a sublane multiple (dense stores + free
    # reshape), Ho padded to a whole number of row tiles.
    Wo_p = _round_up(Wo, 8)
    Wp_p = Wo_p + K - 1

    if row_tile is None:
        # Per-output-row VMEM cost: double-buffered input + output rows plus
        # the f32 scratch row.  Default 32 MiB budget is safe on v7x's 64 MiB
        # VMEM; raise vmem_budget_bytes on v5e/v6e (128 MiB) for bigger tiles.
        per_row = (2 * _vmem_bytes((1, Wp_p, Cin), x_nchw.dtype)
                   + 2 * _vmem_bytes((1, Wo_p, Cout), x_nchw.dtype)
                   + _vmem_bytes((1, Wo_p, Cin), jnp.float32))
        row_tile = max(8, vmem_budget_bytes // max(per_row, 1))
    TH = int(max(1, min(row_tile, Ho)))
    T = -(-Ho // TH)                    # cdiv
    Ho_p = T * TH
    THK = TH + K - 1
    Hp_p = Ho_p + K - 1

    # NCHW -> NHWC, zero-pad, and fold the K-1 halo rows of each row tile into
    # the same materialization pass, so the kernel sees plain non-overlapping
    # blocks (standard auto-pipelined BlockSpecs, both grid axes parallel).
    # TODO(synk): if the surrounding model keeps activations in NHWC, drop the
    # boundary transposes and feed/emit NHWC directly.
    x = jnp.transpose(x_nchw, (0, 2, 3, 1))
    x = jnp.pad(x, ((0, 0),
                    (padding, Hp_p - H - padding),
                    (padding, Wp_p - W - padding),
                    (0, 0)))
    x_tiles = jnp.stack([x[:, t * TH: t * TH + THK] for t in range(T)], axis=1)
    # x_tiles: (N, T, THK, Wp_p, Cin)

    dww = dw_w.reshape(K * K, Cin)          # flattened depthwise taps
    pww = pw_w.astype(matmul_dtype)         # bf16 operands on v6e/v7x if requested

    # Explicit per-kernel VMEM budget (double-buffered blocks + scratch).
    est = (2 * _vmem_bytes((THK, Wp_p, Cin), x.dtype)
           + 2 * _vmem_bytes((TH, Wo_p, Cout), x_nchw.dtype)
           + _vmem_bytes((TH, Wo_p, Cin), jnp.float32)
           + _vmem_bytes((K * K, Cin), dww.dtype)
           + _vmem_bytes((Cin, Cout), pww.dtype)
           + (2 << 20))
    vmem_limit = int(min(max(est, 32 * 1024 * 1024), 100 * 1024 * 1024))

    kernel = functools.partial(_sepconv_kernel, matmul_dtype=matmul_dtype)

    out_nhwc = pl.pallas_call(
        kernel,
        out_shape=jax.ShapeDtypeStruct((N, Ho_p, Wo_p, Cout), x_nchw.dtype),
        grid_spec=pltpu.PrefetchScalarGridSpec(
            num_scalar_prefetch=0,
            grid=(N, T),
            in_specs=[
                pl.BlockSpec((None, None, THK, Wp_p, Cin),
                             lambda n, t: (n, t, 0, 0, 0)),
                pl.BlockSpec((K * K, Cin), lambda n, t: (0, 0)),
                pl.BlockSpec((1, Cin), lambda n, t: (0, 0)),
                pl.BlockSpec((Cin, Cout), lambda n, t: (0, 0)),
                pl.BlockSpec((1, Cout), lambda n, t: (0, 0)),
            ],
            out_specs=pl.BlockSpec((None, TH, Wo_p, Cout),
                                   lambda n, t: (n, t, 0, 0)),
            scratch_shapes=[pltpu.VMEM((TH, Wo_p, Cin), jnp.float32)],
        ),
        compiler_params=pltpu.CompilerParams(
            dimension_semantics=("parallel", "parallel"),
            vmem_limit_bytes=vmem_limit),
    )(x_tiles, dww, dw_b, pww, pw_b)

    # Crop padding, NHWC -> NCHW (interface parity with the PyTorch module).
    out = out_nhwc[:, :Ho, :Wo, :]
    return jnp.transpose(out, (0, 3, 1, 2))


def _reference(x_nchw, dw_w, dw_b, pw_w, pw_b, *, K, padding):
    """Plain-JAX reference (lax conv) for sanity checking."""
    N, Cin, H, W = x_nchw.shape
    rhs_dw = jnp.transpose(dw_w, (2, 0, 1))[:, None, :, :]        # (Cin,1,K,K)
    y = jax.lax.conv_general_dilated(
        x_nchw, rhs_dw, window_strides=(1, 1),
        padding=((padding, padding), (padding, padding)),
        feature_group_count=Cin,
        dimension_numbers=("NCHW", "OIHW", "NCHW"))
    y = y + dw_b[0][None, :, None, None]
    y = jnp.maximum(y, 0.0)
    rhs_pw = jnp.transpose(pw_w, (1, 0))[:, :, None, None]        # (Cout,Cin,1,1)
    z = jax.lax.conv_general_dilated(
        y, rhs_pw, window_strides=(1, 1), padding=((0, 0), (0, 0)),
        dimension_numbers=("NCHW", "OIHW", "NCHW"))
    z = z + pw_b[0][None, :, None, None]
    return z


if __name__ == "__main__":
    key = jax.random.PRNGKey(0)
    N, Cin, H, W = 2, 4, 16, 16
    Cout, K, pad = 8, 3, 1

    k_x, k_dw, k_db, k_pw, k_pb = jax.random.split(key, 5)
    x = jax.random.normal(k_x, (N, Cin, H, W), jnp.float32)
    dw_w = jax.random.normal(k_dw, (K, K, Cin), jnp.float32) * 0.1
    dw_b = jax.random.normal(k_db, (1, Cin), jnp.float32) * 0.1
    pw_w = jax.random.normal(k_pw, (Cin, Cout), jnp.float32) * 0.1
    pw_b = jax.random.normal(k_pb, (1, Cout), jnp.float32) * 0.1

    ref = _reference(x, dw_w, dw_b, pw_w, pw_b, K=K, padding=pad)

    # f32 pointwise matmul (matches PyTorch numerics), explicit row tiling
    # (TH=8 -> grid (2, 2)) to exercise the tiled pipeline.
    out = sep_conv2d(x, dw_w, dw_b, pw_w, pw_b,
                     kernel_size=K, stride=1, padding=pad, row_tile=8)
    out = jax.block_until_ready(out)
    assert out.shape == (N, Cout, H, W), out.shape
    assert jnp.allclose(out, ref, atol=1e-3, rtol=1e-3), \
        float(jnp.max(jnp.abs(out - ref)))

    # bf16 MXU-operand fast path (v6e/v7x), auto row-tile selection.
    out_bf16 = sep_conv2d(x, dw_w, dw_b, pw_w, pw_b,
                          kernel_size=K, stride=1, padding=pad,
                          matmul_dtype=jnp.bfloat16)
    out_bf16 = jax.block_until_ready(out_bf16)
    assert jnp.allclose(out_bf16, ref, atol=5e-2, rtol=5e-2), \
        float(jnp.max(jnp.abs(out_bf16 - ref)))

    print("KERNEL_OK")
</pallas_src>

<mosaic_0001>
module attributes {stable_mosaic.version = 11 : i64} {
  func.func @_sepconv_kernel(%arg0: i32, %arg1: i32, %arg2: memref<1x1x10x18x4xf32, #tpu.memory_space<vmem>>, %arg3: memref<9x4xf32, #tpu.memory_space<vmem>>, %arg4: memref<1x4xf32, #tpu.memory_space<vmem>>, %arg5: memref<4x8xf32, #tpu.memory_space<vmem>>, %arg6: memref<1x8xf32, #tpu.memory_space<vmem>>, %arg7: memref<1x8x16x8xf32, #tpu.memory_space<vmem>>, %arg8: memref<8x16x4xf32, #tpu.memory_space<vmem>>) attributes {dimension_semantics = [#tpu.dimension_semantics<parallel>, #tpu.dimension_semantics<parallel>], iteration_bounds = array<i64: 2, 2>, scalar_prefetch = 0 : i64, scratch_operands = 1 : i64, tpu.core_type = #tpu.core_type<tc>, window_params = [{transform_indices = @transform_0, window_bounds = array<i64: 1, 1, 10, 18, 4>}, {pipeline_mode = #tpu.pipeline_mode<synchronous>, transform_indices = @transform_1, window_bounds = array<i64: 9, 4>}, {pipeline_mode = #tpu.pipeline_mode<synchronous>, transform_indices = @transform_2, window_bounds = array<i64: 1, 4>}, {pipeline_mode = #tpu.pipeline_mode<synchronous>, transform_indices = @transform_3, window_bounds = array<i64: 4, 8>}, {pipeline_mode = #tpu.pipeline_mode<synchronous>, transform_indices = @transform_4, window_bounds = array<i64: 1, 8>}, {transform_indices = @transform_5, window_bounds = array<i64: 1, 8, 16, 8>}]} {
    %c0 = arith.constant 0 : index
    %c0_0 = arith.constant 0 : index
    %0 = vector.load %arg3[%c0, %c0_0] : memref<9x4xf32, #tpu.memory_space<vmem>>, vector<9x4xf32>
    %c0_1 = arith.constant 0 : index
    %c0_2 = arith.constant 0 : index
    %c0_3 = arith.constant 0 : index
    %c0_4 = arith.constant 0 : index
    %c0_5 = arith.constant 0 : index
    %1 = vector.load %arg2[%c0_1, %c0_2, %c0_3, %c0_4, %c0_5] : memref<1x1x10x18x4xf32, #tpu.memory_space<vmem>>, vector<1x1x8x16x4xf32>
    %2 = vector.shape_cast %1 : vector<1x1x8x16x4xf32> to vector<8x16x4xf32>
    %3 = vector.extract_strided_slice %0 {offsets = [0, 0], sizes = [1, 4], strides = [1, 1]} : vector<9x4xf32> to vector<1x4xf32>
    %4 = vector.shape_cast %3 : vector<1x4xf32> to vector<4xf32>
    %5 = vector.shape_cast %4 : vector<4xf32> to vector<1x1x4xf32>
    %6 = vector.broadcast %5 : vector<1x1x4xf32> to vector<8x16x4xf32>
    %7 = arith.mulf %2, %6 : vector<8x16x4xf32>
    %c0_6 = arith.constant 0 : index
    %c0_7 = arith.constant 0 : index
    %c0_8 = arith.constant 0 : index
    %8 = vector.load %arg8[%c0_6, %c0_7, %c0_8] : memref<8x16x4xf32, #tpu.memory_space<vmem>>, vector<8x16x4xf32>
    tpu.vector_store %arg8[%c0_6, %c0_7, %c0_8], %7 {strides = array<i32>} : memref<8x16x4xf32, #tpu.memory_space<vmem>>, vector<8x16x4xf32>,
    %c0_9 = arith.constant 0 : index
    %c0_10 = arith.constant 0 : index
    %c0_11 = arith.constant 0 : index
    %c1 = arith.constant 1 : index
    %c0_12 = arith.constant 0 : index
    %9 = vector.load %arg2[%c0_9, %c0_10, %c0_11, %c1, %c0_12] : memref<1x1x10x18x4xf32, #tpu.memory_space<vmem>>, vector<1x1x8x16x4xf32>
    %10 = vector.shape_cast %9 : vector<1x1x8x16x4xf32> to vector<8x16x4xf32>
    %11 = vector.extract_strided_slice %0 {offsets = [1, 0], sizes = [1, 4], strides = [1, 1]} : vector<9x4xf32> to vector<1x4xf32>
    %12 = vector.shape_cast %11 : vector<1x4xf32> to vector<4xf32>
    %13 = vector.shape_cast %12 : vector<4xf32> to vector<1x1x4xf32>
    %14 = vector.broadcast %13 : vector<1x1x4xf32> to vector<8x16x4xf32>
    %15 = arith.mulf %10, %14 : vector<8x16x4xf32>
    %c0_13 = arith.constant 0 : index
    %c0_14 = arith.constant 0 : index
    %c0_15 = arith.constant 0 : index
    %16 = vector.load %arg8[%c0_13, %c0_14, %c0_15] : memref<8x16x4xf32, #tpu.memory_space<vmem>>, vector<8x16x4xf32>
    %17 = arith.addf %16, %15 : vector<8x16x4xf32>
    %c0_16 = arith.constant 0 : index
    %c0_17 = arith.constant 0 : index
    %c0_18 = arith.constant 0 : index
    %18 = vector.load %arg8[%c0_16, %c0_17, %c0_18] : memref<8x16x4xf32, #tpu.memory_space<vmem>>, vector<8x16x4xf32>
    tpu.vector_store %arg8[%c0_16, %c0_17, %c0_18], %17 {strides = array<i32>} : memref<8x16x4xf32, #tpu.memory_space<vmem>>, vector<8x16x4xf32>,
    %c0_19 = arith.constant 0 : index
    %c0_20 = arith.constant 0 : index
    %c0_21 = arith.constant 0 : index
    %c2 = arith.constant 2 : index
    %c0_22 = arith.constant 0 : index
    %19 = vector.load %arg2[%c0_19, %c0_20, %c0_21, %c2, %c0_22] : memref<1x1x10x18x4xf32, #tpu.memory_space<vmem>>, vector<1x1x8x16x4xf32>
    %20 = vector.shape_cast %19 : vector<1x1x8x16x4xf32> to vector<8x16x4xf32>
    %21 = vector.extract_strided_slice %0 {offsets = [2, 0], sizes = [1, 4], strides = [1, 1]} : vector<9x4xf32> to vector<1x4xf32>
    %22 = vector.shape_cast %21 : vector<1x4xf32> to vector<4xf32>
    %23 = vector.shape_cast %22 : vector<4xf32> to vector<1x1x4xf32>
    %24 = vector.broadcast %23 : vector<1x1x4xf32> to vector<8x16x4xf32>
    %25 = arith.mulf %20, %24 : vector<8x16x4xf32>
    %c0_23 = arith.constant 0 : index
    %c0_24 = arith.constant 0 : index
    %c0_25 = arith.constant 0 : index
    %26 = vector.load %arg8[%c0_23, %c0_24, %c0_25] : memref<8x16x4xf32, #tpu.memory_space<vmem>>, vector<8x16x4xf32>
    %27 = arith.addf %26, %25 : vector<8x16x4xf32>
    %c0_26 = arith.constant 0 : index
    %c0_27 = arith.constant 0 : index
    %c0_28 = arith.constant 0 : index
    %28 = vector.load %arg8[%c0_26, %c0_27, %c0_28] : memref<8x16x4xf32, #tpu.memory_space<vmem>>, vector<8x16x4xf32>
    tpu.vector_store %arg8[%c0_26, %c0_27, %c0_28], %27 {strides = array<i32>} : memref<8x16x4xf32, #tpu.memory_space<vmem>>, vector<8x16x4xf32>,
    %c0_29 = arith.constant 0 : index
    %c0_30 = arith.constant 0 : index
    %c1_31 = arith.constant 1 : index
    %c0_32 = arith.constant 0 : index
    %c0_33 = arith.constant 0 : index
    %29 = vector.load %arg2[%c0_29, %c0_30, %c1_31, %c0_32, %c0_33] : memref<1x1x10x18x4xf32, #tpu.memory_space<vmem>>, vector<1x1x8x16x4xf32>
    %30 = vector.shape_cast %29 : vector<1x1x8x16x4xf32> to vector<8x16x4xf32>
    %31 = vector.extract_strided_slice %0 {offsets = [3, 0], sizes = [1, 4], strides = [1, 1]} : vector<9x4xf32> to vector<1x4xf32>
    %32 = vector.shape_cast %31 : vector<1x4xf32> to vector<4xf32>
    %33 = vector.shape_cast %32 : vector<4xf32> to vector<1x1x4xf32>
    %34 = vector.broadcast %33 : vector<1x1x4xf32> to vector<8x16x4xf32>
    %35 = arith.mulf %30, %34 : vector<8x16x4xf32>
    %c0_34 = arith.constant 0 : index
    %c0_35 = arith.constant 0 : index
    %c0_36 = arith.constant 0 : index
    %36 = vector.load %arg8[%c0_34, %c0_35, %c0_36] : memref<8x16x4xf32, #tpu.memory_space<vmem>>, vector<8x16x4xf32>
    %37 = arith.addf %36, %35 : vector<8x16x4xf32>
    %c0_37 = arith.constant 0 : index
    %c0_38 = arith.constant 0 : index
    %c0_39 = arith.constant 0 : index
    %38 = vector.load %arg8[%c0_37, %c0_38, %c0_39] : memref<8x16x4xf32, #tpu.memory_space<vmem>>, vector<8x16x4xf32>
    tpu.vector_store %arg8[%c0_37, %c0_38, %c0_39], %37 {strides = array<i32>} : memref<8x16x4xf32, #tpu.memory_space<vmem>>, vector<8x16x4xf32>,
    %c0_40 = arith.constant 0 : index
    %c0_41 = arith.constant 0 : index
    %c1_42 = arith.constant 1 : index
    %c1_43 = arith.constant 1 : index
    %c0_44 = arith.constant 0 : index
    %39 = vector.load %arg2[%c0_40, %c0_41, %c1_42, %c1_43, %c0_44] : memref<1x1x10x18x4xf32, #tpu.memory_space<vmem>>, vector<1x1x8x16x4xf32>
    %40 = vector.shape_cast %39 : vector<1x1x8x16x4xf32> to vector<8x16x4xf32>
    %41 = vector.extract_strided_slice %0 {offsets = [4, 0], sizes = [1, 4], strides = [1, 1]} : vector<9x4xf32> to vector<1x4xf32>
    %42 = vector.shape_cast %41 : vector<1x4xf32> to vector<4xf32>
    %43 = vector.shape_cast %42 : vector<4xf32> to vector<1x1x4xf32>
    %44 = vector.broadcast %43 : vector<1x1x4xf32> to vector<8x16x4xf32>
    %45 = arith.mulf %40, %44 : vector<8x16x4xf32>
    %c0_45 = arith.constant 0 : index
    %c0_46 = arith.constant 0 : index
    %c0_47 = arith.constant 0 : index
    %46 = vector.load %arg8[%c0_45, %c0_46, %c0_47] : memref<8x16x4xf32, #tpu.memory_space<vmem>>, vector<8x16x4xf32>
    %47 = arith.addf %46, %45 : vector<8x16x4xf32>
    %c0_48 = arith.constant 0 : index
    %c0_49 = arith.constant 0 : index
    %c0_50 = arith.constant 0 : index
    %48 = vector.load %arg8[%c0_48, %c0_49, %c0_50] : memref<8x16x4xf32, #tpu.memory_space<vmem>>, vector<8x16x4xf32>
    tpu.vector_store %arg8[%c0_48, %c0_49, %c0_50], %47 {strides = array<i32>} : memref<8x16x4xf32, #tpu.memory_space<vmem>>, vector<8x16x4xf32>,
    %c0_51 = arith.constant 0 : index
    %c0_52 = arith.constant 0 : index
    %c1_53 = arith.constant 1 : index
    %c2_54 = arith.constant 2 : index
    %c0_55 = arith.constant 0 : index
    %49 = vector.load %arg2[%c0_51, %c0_52, %c1_53, %c2_54, %c0_55] : memref<1x1x10x18x4xf32, #tpu.memory_space<vmem>>, vector<1x1x8x16x4xf32>
    %50 = vector.shape_cast %49 : vector<1x1x8x16x4xf32> to vector<8x16x4xf32>
    %51 = vector.extract_strided_slice %0 {offsets = [5, 0], sizes = [1, 4], strides = [1, 1]} : vector<9x4xf32> to vector<1x4xf32>
    %52 = vector.shape_cast %51 : vector<1x4xf32> to vector<4xf32>
    %53 = vector.shape_cast %52 : vector<4xf32> to vector<1x1x4xf32>
    %54 = vector.broadcast %53 : vector<1x1x4xf32> to vector<8x16x4xf32>
    %55 = arith.mulf %50, %54 : vector<8x16x4xf32>
    %c0_56 = arith.constant 0 : index
    %c0_57 = arith.constant 0 : index
    %c0_58 = arith.constant 0 : index
    %56 = vector.load %arg8[%c0_56, %c0_57, %c0_58] : memref<8x16x4xf32, #tpu.memory_space<vmem>>, vector<8x16x4xf32>
    %57 = arith.addf %56, %55 : vector<8x16x4xf32>
    %c0_59 = arith.constant 0 : index
    %c0_60 = arith.constant 0 : index
    %c0_61 = arith.constant 0 : index
    %58 = vector.load %arg8[%c0_59, %c0_60, %c0_61] : memref<8x16x4xf32, #tpu.memory_space<vmem>>, vector<8x16x4xf32>
    tpu.vector_store %arg8[%c0_59, %c0_60, %c0_61], %57 {strides = array<i32>} : memref<8x16x4xf32, #tpu.memory_space<vmem>>, vector<8x16x4xf32>,
    %c0_62 = arith.constant 0 : index
    %c0_63 = arith.constant 0 : index
    %c2_64 = arith.constant 2 : index
    %c0_65 = arith.constant 0 : index
    %c0_66 = arith.constant 0 : index
    %59 = vector.load %arg2[%c0_62, %c0_63, %c2_64, %c0_65, %c0_66] : memref<1x1x10x18x4xf32, #tpu.memory_space<vmem>>, vector<1x1x8x16x4xf32>
    %60 = vector.shape_cast %59 : vector<1x1x8x16x4xf32> to vector<8x16x4xf32>
    %61 = vector.extract_strided_slice %0 {offsets = [6, 0], sizes = [1, 4], strides = [1, 1]} : vector<9x4xf32> to vector<1x4xf32>
    %62 = vector.shape_cast %61 : vector<1x4xf32> to vector<4xf32>
    %63 = vector.shape_cast %62 : vector<4xf32> to vector<1x1x4xf32>
    %64 = vector.broadcast %63 : vector<1x1x4xf32> to vector<8x16x4xf32>
    %65 = arith.mulf %60, %64 : vector<8x16x4xf32>
    %c0_67 = arith.constant 0 : index
    %c0_68 = arith.constant 0 : index
    %c0_69 = arith.constant 0 : index
    %66 = vector.load %arg8[%c0_67, %c0_68, %c0_69] : memref<8x16x4xf32, #tpu.memory_space<vmem>>, vector<8x16x4xf32>
    %67 = arith.addf %66, %65 : vector<8x16x4xf32>
    %c0_70 = arith.constant 0 : index
    %c0_71 = arith.constant 0 : index
    %c0_72 = arith.constant 0 : index
    %68 = vector.load %arg8[%c0_70, %c0_71, %c0_72] : memref<8x16x4xf32, #tpu.memory_space<vmem>>, vector<8x16x4xf32>
    tpu.vector_store %arg8[%c0_70, %c0_71, %c0_72], %67 {strides = array<i32>} : memref<8x16x4xf32, #tpu.memory_space<vmem>>, vector<8x16x4xf32>,
    %c0_73 = arith.constant 0 : index
    %c0_74 = arith.constant 0 : index
    %c2_75 = arith.constant 2 : index
    %c1_76 = arith.constant 1 : index
    %c0_77 = arith.constant 0 : index
    %69 = vector.load %arg2[%c0_73, %c0_74, %c2_75, %c1_76, %c0_77] : memref<1x1x10x18x4xf32, #tpu.memory_space<vmem>>, vector<1x1x8x16x4xf32>
    %70 = vector.shape_cast %69 : vector<1x1x8x16x4xf32> to vector<8x16x4xf32>
    %71 = vector.extract_strided_slice %0 {offsets = [7, 0], sizes = [1, 4], strides = [1, 1]} : vector<9x4xf32> to vector<1x4xf32>
    %72 = vector.shape_cast %71 : vector<1x4xf32> to vector<4xf32>
    %73 = vector.shape_cast %72 : vector<4xf32> to vector<1x1x4xf32>
    %74 = vector.broadcast %73 : vector<1x1x4xf32> to vector<8x16x4xf32>
    %75 = arith.mulf %70, %74 : vector<8x16x4xf32>
    %c0_78 = arith.constant 0 : index
    %c0_79 = arith.constant 0 : index
    %c0_80 = arith.constant 0 : index
    %76 = vector.load %arg8[%c0_78, %c0_79, %c0_80] : memref<8x16x4xf32, #tpu.memory_space<vmem>>, vector<8x16x4xf32>
    %77 = arith.addf %76, %75 : vector<8x16x4xf32>
    %c0_81 = arith.constant 0 : index
    %c0_82 = arith.constant 0 : index
    %c0_83 = arith.constant 0 : index
    %78 = vector.load %arg8[%c0_81, %c0_82, %c0_83] : memref<8x16x4xf32, #tpu.memory_space<vmem>>, vector<8x16x4xf32>
    tpu.vector_store %arg8[%c0_81, %c0_82, %c0_83], %77 {strides = array<i32>} : memref<8x16x4xf32, #tpu.memory_space<vmem>>, vector<8x16x4xf32>,
    %c0_84 = arith.constant 0 : index
    %c0_85 = arith.constant 0 : index
    %c2_86 = arith.constant 2 : index
    %c2_87 = arith.constant 2 : index
    %c0_88 = arith.constant 0 : index
    %79 = vector.load %arg2[%c0_84, %c0_85, %c2_86, %c2_87, %c0_88] : memref<1x1x10x18x4xf32, #tpu.memory_space<vmem>>, vector<1x1x8x16x4xf32>
    %80 = vector.shape_cast %79 : vector<1x1x8x16x4xf32> to vector<8x16x4xf32>
    %81 = vector.extract_strided_slice %0 {offsets = [8, 0], sizes = [1, 4], strides = [1, 1]} : vector<9x4xf32> to vector<1x4xf32>
    %82 = vector.shape_cast %81 : vector<1x4xf32> to vector<4xf32>
    %83 = vector.shape_cast %82 : vector<4xf32> to vector<1x1x4xf32>
    %84 = vector.broadcast %83 : vector<1x1x4xf32> to vector<8x16x4xf32>
    %85 = arith.mulf %80, %84 : vector<8x16x4xf32>
    %c0_89 = arith.constant 0 : index
    %c0_90 = arith.constant 0 : index
    %c0_91 = arith.constant 0 : index
    %86 = vector.load %arg8[%c0_89, %c0_90, %c0_91] : memref<8x16x4xf32, #tpu.memory_space<vmem>>, vector<8x16x4xf32>
    %87 = arith.addf %86, %85 : vector<8x16x4xf32>
    %c0_92 = arith.constant 0 : index
    %c0_93 = arith.constant 0 : index
    %c0_94 = arith.constant 0 : index
    %88 = vector.load %arg8[%c0_92, %c0_93, %c0_94] : memref<8x16x4xf32, #tpu.memory_space<vmem>>, vector<8x16x4xf32>
    tpu.vector_store %arg8[%c0_92, %c0_93, %c0_94], %87 {strides = array<i32>} : memref<8x16x4xf32, #tpu.memory_space<vmem>>, vector<8x16x4xf32>,
    %c0_95 = arith.constant 0 : index
    %c0_96 = arith.constant 0 : index
    %89 = vector.load %arg4[%c0_95, %c0_96] : memref<1x4xf32, #tpu.memory_space<vmem>>, vector<1x4xf32>
    %90 = vector.shape_cast %89 : vector<1x4xf32> to vector<4xf32>
    %c0_97 = arith.constant 0 : index
    %c0_98 = arith.constant 0 : index
    %c0_99 = arith.constant 0 : index
    %91 = vector.load %arg8[%c0_97, %c0_98, %c0_99] : memref<8x16x4xf32, #tpu.memory_space<vmem>>, vector<8x16x4xf32>
    %92 = vector.shape_cast %90 : vector<4xf32> to vector<1x1x4xf32>
    %93 = vector.broadcast %92 : vector<1x1x4xf32> to vector<8x16x4xf32>
    %94 = arith.addf %91, %93 : vector<8x16x4xf32>
    %cst = arith.constant 0.000000e+00 : f32
    %95 = vector.broadcast %cst : f32 to vector<8x16x4xf32>
    %96 = arith.maximumf %94, %95 : vector<8x16x4xf32>
    %c0_100 = arith.constant 0 : index
    %c0_101 = arith.constant 0 : index
    %c0_102 = arith.constant 0 : index
    %97 = vector.load %arg8[%c0_100, %c0_101, %c0_102] : memref<8x16x4xf32, #tpu.memory_space<vmem>>, vector<8x16x4xf32>
    tpu.vector_store %arg8[%c0_100, %c0_101, %c0_102], %96 {strides = array<i32>} : memref<8x16x4xf32, #tpu.memory_space<vmem>>, vector<8x16x4xf32>,
    %c0_103 = arith.constant 0 : index
    %c0_104 = arith.constant 0 : index
    %c0_105 = arith.constant 0 : index
    %98 = vector.load %arg8[%c0_103, %c0_104, %c0_105] : memref<8x16x4xf32, #tpu.memory_space<vmem>>, vector<8x16x4xf32>
    %99 = vector.shape_cast %98 : vector<8x16x4xf32> to vector<128x4xf32>
    %c0_106 = arith.constant 0 : index
    %c0_107 = arith.constant 0 : index
    %100 = vector.load %arg5[%c0_106, %c0_107] : memref<4x8xf32, #tpu.memory_space<vmem>>, vector<4x8xf32>
    %cst_108 = arith.constant dense<0.000000e+00> : vector<128x8xf32>
    %101 = tpu.matmul %99, %100, %cst_108 {dimension_numbers = #tpu.dot_dimension_numbers<[1], [0], [0], [1], [0, 0, 1, 1], [], []>} : vector<128x4xf32>, vector<4x8xf32>, vector<128x8xf32> -> vector<128x8xf32>
    %c0_109 = arith.constant 0 : index
    %c0_110 = arith.constant 0 : index
    %102 = vector.load %arg6[%c0_109, %c0_110] : memref<1x8xf32, #tpu.memory_space<vmem>>, vector<1x8xf32>
    %103 = vector.shape_cast %102 : vector<1x8xf32> to vector<8xf32>
    %104 = vector.shape_cast %103 : vector<8xf32> to vector<1x8xf32>
    %105 = vector.broadcast %104 : vector<1x8xf32> to vector<128x8xf32>
    %106 = arith.addf %101, %105 : vector<128x8xf32>
    %107 = vector.shape_cast %106 : vector<128x8xf32> to vector<8x16x8xf32>
    %c0_111 = arith.constant 0 : index
    %c0_112 = arith.constant 0 : index
    %c0_113 = arith.constant 0 : index
    %c0_114 = arith.constant 0 : index
    %108 = vector.load %arg7[%c0_111, %c0_112, %c0_113, %c0_114] : memref<1x8x16x8xf32, #tpu.memory_space<vmem>>, vector<1x8x16x8xf32>
    %109 = vector.shape_cast %108 : vector<1x8x16x8xf32> to vector<8x16x8xf32>
    %110 = vector.shape_cast %107 : vector<8x16x8xf32> to vector<1x8x16x8xf32>
    tpu.vector_store %arg7[%c0_111, %c0_112, %c0_113, %c0_114], %110 {strides = array<i32>} : memref<1x8x16x8xf32, #tpu.memory_space<vmem>>, vector<1x8x16x8xf32>,
    return
  }
  func.func @transform_0(%arg0: i32, %arg1: i32) -> (i32, i32, i32, i32, i32) {
    %c0_i32 = arith.constant 0 : i32
    %c0_i32_0 = arith.constant 0 : i32
    %c0_i32_1 = arith.constant 0 : i32
    %c0_i32_2 = arith.constant 0 : i32
    return %arg0, %arg1, %c0_i32, %c0_i32_0, %c0_i32_1 : i32, i32, i32, i32, i32
  }
  func.func @transform_1(%arg0: i32, %arg1: i32) -> (i32, i32) {
    %c0_i32 = arith.constant 0 : i32
    %c0_i32_0 = arith.constant 0 : i32
    %c0_i32_1 = arith.constant 0 : i32
    return %c0_i32, %c0_i32_0 : i32, i32
  }
  func.func @transform_2(%arg0: i32, %arg1: i32) -> (i32, i32) {
    %c0_i32 = arith.constant 0 : i32
    %c0_i32_0 = arith.constant 0 : i32
    %c0_i32_1 = arith.constant 0 : i32
    return %c0_i32, %c0_i32_0 : i32, i32
  }
  func.func @transform_3(%arg0: i32, %arg1: i32) -> (i32, i32) {
    %c0_i32 = arith.constant 0 : i32
    %c0_i32_0 = arith.constant 0 : i32
    %c0_i32_1 = arith.constant 0 : i32
    return %c0_i32, %c0_i32_0 : i32, i32
  }
  func.func @transform_4(%arg0: i32, %arg1: i32) -> (i32, i32) {
    %c0_i32 = arith.constant 0 : i32
    %c0_i32_0 = arith.constant 0 : i32
    %c0_i32_1 = arith.constant 0 : i32
    return %c0_i32, %c0_i32_0 : i32, i32
  }
  func.func @transform_5(%arg0: i32, %arg1: i32) -> (i32, i32, i32, i32) {
    %c0_i32 = arith.constant 0 : i32
    %c0_i32_0 = arith.constant 0 : i32
    %c0_i32_1 = arith.constant 0 : i32
    return %arg0, %arg1, %c0_i32, %c0_i32_0 : i32, i32, i32, i32
  }
}

</mosaic_0001>

<bundles_post_ra>
// kernel: tpu_custom_call.1
= control target key start
LH: loop header
LB: loop body
LE: loop exit
PB: predicated region body
PF: predicated region fallthrough
CT: control target
= control target key end

     0   :  { %s1532_s18 = smov 0   ;;  %s1534_s19 = smov 0   ;;  %s2297_s0 = inlined_call_operand.vmem [shape: f32[2,2,10,18,4], index: 0, kind: input, shape index: {}]   ;;  %s2298_s1 = inlined_call_operand.vmem [shape: f32[9,4], index: 1, kind: input, shape index: {}]   ;;  %s2299_s2 = inlined_call_operand.vmem [shape: f32[1,4], index: 2, kind: input, shape index: {}]   ;;  %s2300_s3 = inlined_call_operand.vmem [shape: f32[4,8], index: 3, kind: input, shape index: {}]   ;;  %s2301_s4 = inlined_call_operand.vmem [shape: f32[1,8], index: 4, kind: input, shape index: {}]   ;;  %s2302_s5 = inlined_call_operand.vmem [shape: f32[2,16,16,8], index: 5, kind: output, shape index: {}]  }
   0x1   :  { %s1536_s20 = smov 0   ;;  %s1538_s21 = smov 0  }
   0x2   :  { %s1540_s22 = smov 0  }
   0x3 LB: > { %s24_s23 = sadd.s32 1, %s1492_s20  ;;  %s27_s24 = sadd.s32 1, %s1496_s21  ;;  %s1500_s22 = sphi %s1540_s22, %s15_s22   ;;  %s1496_s21 = sphi %s1538_s21, %s2306_s21   ;;  %s1492_s20 = sphi %s1536_s20, %s2305_s20   ;;  %s1488_s19 = sphi %s1534_s19, %s2304_s19   ;;  %s1484_s18 = sphi %s1532_s18, %s2303_s18  }
   0x4   : > { %p25_p0 = scmp.ge.s32.totalorder %s24_s23, 2  ;;  %p1292_p1 = scmp.ge.s32.totalorder %s1500_s22, 1 }
   0x5   : > { %p207_p2 = scmp.lt.s32.totalorder %s1500_s22, 5 }
   0x6   : > { %s2308_s23 = smov (%p25_p0, %s24_s23), 0  ;;  %s2310_s24 = smov (!%p25_p0, %s27_s24), %s1496_s21 }
   0x7   : > { %p208_p3 = pnand %p1292_p1, %p207_p2  ;;  %p29_p4 = scmp.ge.s32.totalorder %s2310_s24, 2 }
   0x8   : > { %p244_p5 = scmp.lt.s32.totalorder (!%p208_p3), %s1488_s19, 1  ;;  %p246_p6 = scmp.lt.s32.totalorder (!%p208_p3), %s1484_s18, 1 }
   0x9   : > { %s2312_s24 = smov (%p29_p4, %s2310_s24), 0  ;;  %211 = sbr.rel (%p208_p3) target bundleno = 367 (0x16f), region = 40 }
   0xa   : > { %s1294_s16 = sshll.u32 (!%p208_p3), %s1484_s18, 3 }
   0xb   : > { %p256_p7 = scmp.lt.s32.totalorder (!%p208_p3), %s1294_s16, 15 }
   0xe   : > { %v1050_v0 = vld [vmem:[%s2300_s3] sm:$0xf]  ;;  %vm1103_vm0 = vcmask 1043456   ;;  %s2314_s19 = smov (!%p244_p5, %s1488_s19), 1  ;;  %vm299_vm1 = vcmask 31744   ;;  %s2316_s16 = smov (!%p256_p7, %s1294_s16), 15 }
   0xf   : > { %1414 = vmatpush.msk.msra.mxu2 %vm1103_vm0, %v1050_v0  ;;  %1415 = vmatpush.msk.msra.mxu3 %vm1103_vm0, %v1050_v0  ;;  %s247_s27 = scalar_select %p246_p6, %s1484_s18, 1  ;;  %v1575_v1 = vld [vmem:[%s2298_s1] sm:$0xff]  ;;  %vm1172_vm2 = vcmask 64512  }
  0x10   : > { %1394 = vmatpush.msk.msra.mxu0 %vm1103_vm0, %v1050_v0  ;;  %1413 = vmatpush.msk.msra.mxu1 %vm1103_vm0, %v1050_v0  ;;  %s1417_s28 = smul.u32 60, %s2314_s19  ;;  %v1578_v2 = vperm.slane %v1575_v1, 0  ;;  %v1602_v9 = vperm.slane %v1575_v1, 1  ;;  %v1665_v37 = vperm.slane %v1575_v1, 2  ;;  %s1295_s17 = sshll.u32 %s2316_s16, 1 }
  0x11   : > { %s1416_s6 = smul.u32 30, %s247_s27  ;;  %s1296_s25 = sshll.u32 %s2314_s19, 5 }
  0x12   : > { %s260_s26 = sadd.s32 %s1296_s25, %s1295_s17 }
  0x13   : > { %s250_s7 = sadd.s32 %s1417_s28, %s1416_s6  ;;  %s1297_s27 = sshll.u32 %s260_s26, 3 }
  0x14   : > { %s1293_s8 = sshll.u32 %s250_s7, 3  ;;  %s2248_s7 = scalar_lea.vmem %s2302_s5, %s1297_s27 }
  0x15   : > { %s1583_s11 = scalar_lea.vmem %s2297_s0, %s1293_s8 }
  0x16   : > { %v1586_v3 = vld [vmem:[%s1583_s11 + $0x60] sm:$0xff]  ;;  %v1591_v5 = vld [vmem:[%s1583_s11 + $0x78] sm:$0xff]  ;;  %v1594_v6 = vld [vmem:[%s1583_s11 + $0x90] sm:$0xff] }
  0x17   : > { %v291_v4 = vmul.f32 %v1578_v2, %v1586_v3  ;;  %v295_v7 = vmul.f32 %v1594_v6, %v1578_v2  ;;  %v293_v8 = vmul.f32 %v1591_v5, %v1578_v2  ;;  %v1605_v10 = vld [vmem:[%s1583_s11 + $0xa8] sm:$0xff]  ;;  %v266_v12 = vld [vmem:[%s1583_s11] sm:$0xff]  ;;  %v1615_v14 = vld [vmem:[%s1583_s11 + $0x91] sm:$0xff] }
  0x18   : > { %v1608_v11 = vld [vmem:[%s1583_s11 + $0x61] sm:$0xff]  ;;  %v297_v13 = vmul.f32 %v1605_v10, %v1578_v2  ;;  %v283_v15 = vmul.f32 %v1578_v2, %v266_v12  ;;  %v1619_v16 = vld [vmem:[%s1583_s11 + $0x18] sm:$0xff]  ;;  %v1622_v17 = vld [vmem:[%s1583_s11 + $0x30] sm:$0xff]  ;;  %v345_v22 = vmul.f32 %v1615_v14, %v1602_v9 }
  0x19   : > { %308 = vst.msk [vmem:[#allocation2 + $0x40] sm:$0xff] %vm299_vm1, %v291_v4  ;;  %v287_v18 = vmul.f32 %v1622_v17, %v1578_v2  ;;  %v285_v19 = vmul.f32 %v1619_v16, %v1578_v2  ;;  %v341_v20 = vmul.f32 %v1602_v9, %v1608_v11  ;;  %v1634_v21 = vld [vmem:[%s1583_s11 + $0x68] sm:$0xff]  ;;  %v1643_v25 = vld [vmem:[%s1583_s11 + $0x31] sm:$0xff]  ;;  %v1653_v30 = vld [vmem:[%s1583_s11 + $0x79] sm:$0xff] }
  0x1a   : > { %312 = vst.msk [vmem:[#allocation2 + $0x60] sm:$0xff] %vm299_vm1, %v295_v7  ;;  %v316_v23 = vld [vmem:[%s1583_s11 + $0x1] sm:$0xff]  ;;  %v292_v24 = vmul.f32 %v1578_v2, %v1634_v21  ;;  %v1646_v26 = vld [vmem:[%s1583_s11 + $0x98] sm:$0xff]  ;;  %v1657_v33 = vld [vmem:[%s1583_s11 + $0x69] sm:$0xff]  ;;  %v337_v35 = vmul.f32 %v1643_v25, %v1602_v9  ;;  %v343_v44 = vmul.f32 %v1653_v30, %v1602_v9 }
  0x1b   : > { %310 = vst.msk [vmem:[#allocation2 + $0x50] sm:$0xff] %vm299_vm1, %v293_v8  ;;  %v296_v28 = vmul.f32 %v1646_v26, %v1578_v2  ;;  %v333_v32 = vmul.f32 %v1602_v9, %v316_v23  ;;  %v267_v36 = vld [vmem:[%s1583_s11 + $0x8] sm:$0xff]  ;;  %v1668_v38 = vld [vmem:[%s1583_s11 + $0x99] sm:$0xff]  ;;  %v342_v43 = vmul.f32 %v1602_v9, %v1657_v33 }
  0x1c   : > { %314 = vst.msk [vmem:[#allocation2 + $0x70] sm:$0xff] %vm299_vm1, %v297_v13  ;;  %v284_v39 = vmul.f32 %v1578_v2, %v267_v36  ;;  %v1672_v40 = vld [vmem:[%s1583_s11 + $0x62] sm:$0xff]  ;;  %v1675_v41 = vld [vmem:[%s1583_s11 + $0x92] sm:$0xff]  ;;  %v346_v50 = vmul.f32 %v1668_v38, %v1602_v9 }
  0x1d   : > { %300 = vst.msk [vmem:[#allocation2] sm:$0xff] %vm299_vm1, %v283_v15  ;;  %v1683_v45 = vld [vmem:[%s1583_s11 + $0xa9] sm:$0xff]  ;;  %v1687_v48 = vld [vmem:[%s1583_s11 + $0x38] sm:$0xff]  ;;  %v422_v53 = vmul.f32 %v1665_v37, %v1672_v40  ;;  %v426_v56 = vmul.f32 %v1675_v41, %v1665_v37 }
  0x1e   : > { %304 = vst.msk [vmem:[#allocation2 + $0x20] sm:$0xff] %vm299_vm1, %v287_v18  ;;  %v317_v51 = vld [vmem:[%s1583_s11 + $0x9] sm:$0xff]  ;;  %v288_v52 = vmul.f32 %v1687_v48, %v1578_v2  ;;  %v347_v60 = vmul.f32 %v1683_v45, %v1602_v9  ;;  %v1704_v61 = vld [vmem:[%s1583_s11 + $0x32] sm:$0xff] }
  0x1f   : > { %302 = vst.msk [vmem:[#allocation2 + $0x10] sm:$0xff] %vm299_vm1, %v285_v19  ;;  %v397_v57 = vld [vmem:[%s1583_s11 + $0x2] sm:$0xff]  ;;  %v334_v63 = vmul.f32 %v1602_v9, %v317_v51  ;;  %v1710_v8 = vld [vmem:[%s1583_s11 + $0x39] sm:$0xff]  ;;  %v1714_v18 = vld [vmem:[%s1583_s11 + $0x6a] sm:$0xff] }
  0x20   : > { %v357_v27 = vld [vmem:[#allocation2 + $0x40] sm:$0xff]  ;;  %309 = vst.msk [vmem:[#allocation2 + $0x48] sm:$0xff] %vm299_vm1, %v292_v24  ;;  %v414_v15 = vmul.f32 %v1665_v37, %v397_v57 }
  0x21   : > { %v373_v29 = vadd.f32 %v357_v27, %v341_v20  ;;  %v361_v31 = vld [vmem:[#allocation2 + $0x60] sm:$0xff]  ;;  %313 = vst.msk [vmem:[#allocation2 + $0x68] sm:$0xff] %vm299_vm1, %v296_v28  ;;  %v1725_v27 = vperm.slane %v1575_v1, 3 }
  0x22   : > { %v377_v34 = vadd.f32 %v361_v31, %v345_v22  ;;  %301 = vst.msk [vmem:[#allocation2 + $0x8] sm:$0xff] %vm299_vm1, %v284_v39  ;;  %v359_v55 = vld [vmem:[#allocation2 + $0x50] sm:$0xff]  ;;  %v1718_v19 = vld [vmem:[%s1583_s11 + $0x7a] sm:$0xff]  ;;  %v418_v22 = vmul.f32 %v1704_v61, %v1665_v37  ;;  %v338_v31 = vmul.f32 %v1710_v8, %v1602_v9 }
  0x23   : > { %389 = vst.msk [vmem:[#allocation2 + $0x40] sm:$0xff] %vm299_vm1, %v373_v29  ;;  %v375_v59 = vadd.f32 %v359_v55, %v343_v44  ;;  %v363_v0 = vld [vmem:[#allocation2 + $0x70] sm:$0xff]  ;;  %v1728_v28 = vld [vmem:[%s1583_s11 + $0x9a] sm:$0xff]  ;;  %v424_v39 = vmul.f32 %v1718_v19, %v1665_v37 }
  0x24   : > { %393 = vst.msk [vmem:[#allocation2 + $0x60] sm:$0xff] %vm299_vm1, %v377_v34  ;;  %v349_v42 = vld [vmem:[#allocation2] sm:$0xff]  ;;  %v379_v24 = vadd.f32 %v363_v0, %v347_v60  ;;  %v423_v34 = vmul.f32 %v1665_v37, %v1714_v18  ;;  %v398_v44 = vld [vmem:[%s1583_s11 + $0xa] sm:$0xff]  ;;  %v496_v0 = vmul.f32 %v1619_v16, %v1725_v27 }
  0x25   : > { %v365_v46 = vadd.f32 %v349_v42, %v333_v32  ;;  %v353_v47 = vld [vmem:[#allocation2 + $0x20] sm:$0xff]  ;;  %305 = vst.msk [vmem:[#allocation2 + $0x28] sm:$0xff] %vm299_vm1, %v288_v52  ;;  %v508_v52 = vmul.f32 %v1605_v10, %v1725_v27 }
  0x26   : > { %v369_v49 = vadd.f32 %v353_v47, %v337_v35  ;;  %391 = vst.msk [vmem:[#allocation2 + $0x50] sm:$0xff] %vm299_vm1, %v375_v59  ;;  %v504_v47 = vmul.f32 %v1591_v5, %v1725_v27  ;;  %v1755_v59 = vld [vmem:[%s1583_s11 + $0x3a] sm:$0xff] }
  0x27   : > { %381 = vst.msk [vmem:[#allocation2] sm:$0xff] %vm299_vm1, %v365_v46  ;;  %v358_v54 = vld [vmem:[#allocation2 + $0x48] sm:$0xff] }
  0x28   : > { %385 = vst.msk [vmem:[#allocation2 + $0x20] sm:$0xff] %vm299_vm1, %v369_v49  ;;  %v374_v58 = vadd.f32 %v358_v54, %v342_v43  ;;  %v362_v62 = vld [vmem:[#allocation2 + $0x68] sm:$0xff]  ;;  %v427_v43 = vmul.f32 %v1728_v28, %v1665_v37 }
  0x29   : > { %v378_v7 = vadd.f32 %v362_v62, %v346_v50  ;;  %v350_v23 = vld [vmem:[#allocation2 + $0x8] sm:$0xff]  ;;  %395 = vst.msk [vmem:[#allocation2 + $0x70] sm:$0xff] %vm299_vm1, %v379_v24 }
  0x2a   : > { %v438_v4 = vld [vmem:[#allocation2 + $0x40] sm:$0xff]  ;;  %390 = vst.msk [vmem:[#allocation2 + $0x48] sm:$0xff] %vm299_vm1, %v374_v58  ;;  %v366_v29 = vadd.f32 %v350_v23, %v334_v63  ;;  %v1745_v49 = vld [vmem:[%s1583_s11 + $0xaa] sm:$0xff] }
  0x2b   : > { %v454_v12 = vadd.f32 %v438_v4, %v422_v53  ;;  %v442_v13 = vld [vmem:[#allocation2 + $0x60] sm:$0xff]  ;;  %394 = vst.msk [vmem:[#allocation2 + $0x68] sm:$0xff] %vm299_vm1, %v378_v7  ;;  %v428_v60 = vmul.f32 %v1745_v49, %v1665_v37  ;;  %v1762_v4 = vld [vmem:[%s1583_s11 + $0x48] sm:$0xff] }
  0x2c   : > { %v458_v20 = vadd.f32 %v442_v13, %v426_v56  ;;  %382 = vst.msk [vmem:[#allocation2 + $0x8] sm:$0xff] %vm299_vm1, %v366_v29  ;;  %v354_v46 = vld [vmem:[#allocation2 + $0x28] sm:$0xff]  ;;  %v415_v56 = vmul.f32 %v1665_v37, %v398_v44 }
  0x2d   : > { %470 = vst.msk [vmem:[#allocation2 + $0x40] sm:$0xff] %vm299_vm1, %v454_v12  ;;  %v370_v51 = vadd.f32 %v354_v46, %v338_v31  ;;  %v440_v54 = vld [vmem:[#allocation2 + $0x50] sm:$0xff]  ;;  %v500_v12 = vmul.f32 %v1762_v4, %v1725_v27  ;;  %v1792_v46 = vld [vmem:[%s1583_s11 + $0xc0] sm:$0xff] }
  0x2e   : > { %474 = vst.msk [vmem:[#allocation2 + $0x60] sm:$0xff] %vm299_vm1, %v458_v20  ;;  %v430_v32 = vld [vmem:[#allocation2] sm:$0xff]  ;;  %v456_v5 = vadd.f32 %v440_v54, %v424_v39 }
  0x2f   : > { %v446_v35 = vadd.f32 %v430_v32, %v414_v15  ;;  %v434_v36 = vld [vmem:[#allocation2 + $0x20] sm:$0xff]  ;;  %386 = vst.msk [vmem:[#allocation2 + $0x28] sm:$0xff] %vm299_vm1, %v370_v51  ;;  %v1770_v15 = vperm.slane %v1575_v1, 4 }
  0x30   : > { %v450_v42 = vadd.f32 %v434_v36, %v418_v22  ;;  %472 = vst.msk [vmem:[#allocation2 + $0x50] sm:$0xff] %vm299_vm1, %v456_v5  ;;  %v1773_v20 = vld [vmem:[%s1583_s11 + $0x80] sm:$0xff]  ;;  %v419_v22 = vmul.f32 %v1755_v59, %v1665_v37  ;;  %v444_v23 = vld [vmem:[#allocation2 + $0x70] sm:$0xff]  ;;  %v506_v36 = vmul.f32 %v1594_v6, %v1725_v27 }
  0x31   : > { %462 = vst.msk [vmem:[#allocation2] sm:$0xff] %vm299_vm1, %v446_v35  ;;  %v439_v50 = vld [vmem:[#allocation2 + $0x48] sm:$0xff]  ;;  %v505_v29 = vmul.f32 %v1773_v20, %v1725_v27  ;;  %v460_v31 = vadd.f32 %v444_v23, %v428_v60  ;;  %v1781_v35 = vld [vmem:[%s1583_s11 + $0xb0] sm:$0xff]  ;;  %v585_v44 = vmul.f32 %v1653_v30, %v1770_v15  ;;  %v589_v51 = vmul.f32 %v1683_v45, %v1770_v15 }
  0x32   : > { %466 = vst.msk [vmem:[#allocation2 + $0x20] sm:$0xff] %vm299_vm1, %v450_v42  ;;  %v455_v53 = vadd.f32 %v439_v50, %v423_v34  ;;  %v443_v55 = vld [vmem:[#allocation2 + $0x68] sm:$0xff]  ;;  %v509_v42 = vmul.f32 %v1781_v35, %v1725_v27  ;;  %v510_v60 = vmul.f32 %v1792_v46, %v1725_v27  ;;  %v1824_v23 = vperm.slane %v1575_v1, 5 }
  0x33   : > { %v459_v58 = vadd.f32 %v443_v55, %v427_v43  ;;  %v431_v13 = vld [vmem:[#allocation2 + $0x8] sm:$0xff]  ;;  %476 = vst.msk [vmem:[#allocation2 + $0x70] sm:$0xff] %vm299_vm1, %v460_v31 }
  0x34   : > { %v520_v57 = vld [vmem:[#allocation2 + $0x40] sm:$0xff]  ;;  %471 = vst.msk [vmem:[#allocation2 + $0x48] sm:$0xff] %vm299_vm1, %v455_v53  ;;  %v447_v16 = vadd.f32 %v431_v13, %v415_v56 }
  0x35   : > { %v536_v62 = vadd.f32 %v520_v57, %v504_v47  ;;  %v524_v63 = vld [vmem:[#allocation2 + $0x60] sm:$0xff]  ;;  %475 = vst.msk [vmem:[#allocation2 + $0x68] sm:$0xff] %vm299_vm1, %v459_v58 }
  0x36   : > { %v540_v7 = vadd.f32 %v524_v63, %v508_v52  ;;  %463 = vst.msk [vmem:[#allocation2 + $0x8] sm:$0xff] %vm299_vm1, %v447_v16  ;;  %v435_v43 = vld [vmem:[#allocation2 + $0x28] sm:$0xff]  ;;  %v1799_v53 = vld [vmem:[%s1583_s11 + $0x20] sm:$0xff] }
  0x37   : > { %552 = vst.msk [vmem:[#allocation2 + $0x40] sm:$0xff] %vm299_vm1, %v536_v62  ;;  %v451_v50 = vadd.f32 %v435_v43, %v419_v22  ;;  %v522_v54 = vld [vmem:[#allocation2 + $0x50] sm:$0xff]  ;;  %v497_v30 = vmul.f32 %v1799_v53, %v1725_v27  ;;  %v1805_v57 = vld [vmem:[%s1583_s11 + $0x19] sm:$0xff] }
  0x38   : > { %556 = vst.msk [vmem:[#allocation2 + $0x60] sm:$0xff] %vm299_vm1, %v540_v7  ;;  %v512_v24 = vld [vmem:[#allocation2] sm:$0xff]  ;;  %v538_v56 = vadd.f32 %v522_v54, %v506_v36  ;;  %v1813_v7 = vld [vmem:[%s1583_s11 + $0x49] sm:$0xff]  ;;  %v666_v54 = vmul.f32 %v1718_v19, %v1824_v23 }
  0x39   : > { %v528_v32 = vadd.f32 %v512_v24, %v496_v0  ;;  %v516_v34 = vld [vmem:[#allocation2 + $0x20] sm:$0xff]  ;;  %467 = vst.msk [vmem:[#allocation2 + $0x28] sm:$0xff] %vm299_vm1, %v451_v50  ;;  %v577_v0 = vmul.f32 %v1805_v57, %v1770_v15  ;;  %v581_v13 = vmul.f32 %v1813_v7, %v1770_v15  ;;  %v1820_v22 = vld [vmem:[%s1583_s11 + $0x50] sm:$0xff] }
  0x3a   : > { %v532_v39 = vadd.f32 %v516_v34, %v500_v12  ;;  %554 = vst.msk [vmem:[#allocation2 + $0x50] sm:$0xff] %vm299_vm1, %v538_v56  ;;  %v1827_v24 = vld [vmem:[%s1583_s11 + $0x81] sm:$0xff]  ;;  %v501_v31 = vmul.f32 %v1820_v22, %v1725_v27 }
  0x3b   : > { %544 = vst.msk [vmem:[#allocation2] sm:$0xff] %vm299_vm1, %v528_v32  ;;  %v521_v47 = vld [vmem:[#allocation2 + $0x48] sm:$0xff]  ;;  %v526_v32 = vld [vmem:[#allocation2 + $0x70] sm:$0xff]  ;;  %v586_v36 = vmul.f32 %v1827_v24, %v1770_v15 }
  0x3c   : > { %548 = vst.msk [vmem:[#allocation2 + $0x20] sm:$0xff] %vm299_vm1, %v532_v39  ;;  %v537_v52 = vadd.f32 %v521_v47, %v505_v29  ;;  %v525_v55 = vld [vmem:[#allocation2 + $0x68] sm:$0xff]  ;;  %v542_v39 = vadd.f32 %v526_v32, %v510_v60  ;;  %v587_v47 = vmul.f32 %v1615_v14, %v1770_v15 }
  0x3d   : > { %v541_v58 = vadd.f32 %v525_v55, %v509_v42  ;;  %v513_v16 = vld [vmem:[#allocation2 + $0x8] sm:$0xff] }
  0x3e   : > { %v601_v5 = vld [vmem:[#allocation2 + $0x40] sm:$0xff]  ;;  %553 = vst.msk [vmem:[#allocation2 + $0x48] sm:$0xff] %vm299_vm1, %v537_v52  ;;  %v529_v29 = vadd.f32 %v513_v16, %v497_v30 }
  0x3f   : > { %v617_v62 = vadd.f32 %v601_v5, %v585_v44  ;;  %v605_v63 = vld [vmem:[#allocation2 + $0x60] sm:$0xff]  ;;  %557 = vst.msk [vmem:[#allocation2 + $0x68] sm:$0xff] %vm299_vm1, %v541_v58  ;;  %v1835_v44 = vld [vmem:[%s1583_s11 + $0xb1] sm:$0xff]  ;;  %v670_v5 = vmul.f32 %v1745_v49, %v1824_v23 }
  0x40   : > { %v621_v12 = vadd.f32 %v605_v63, %v589_v51  ;;  %545 = vst.msk [vmem:[#allocation2 + $0x8] sm:$0xff] %vm299_vm1, %v529_v29  ;;  %v590_v51 = vmul.f32 %v1835_v44, %v1770_v15  ;;  %v517_v52 = vld [vmem:[#allocation2 + $0x28] sm:$0xff] }
  0x41   : > { %633 = vst.msk [vmem:[#allocation2 + $0x40] sm:$0xff] %vm299_vm1, %v617_v62  ;;  %v1846_v55 = vld [vmem:[%s1583_s11 + $0xc1] sm:$0xff]  ;;  %v533_v56 = vadd.f32 %v517_v52, %v501_v31  ;;  %v603_v62 = vld [vmem:[#allocation2 + $0x50] sm:$0xff] }
  0x42   : > { %637 = vst.msk [vmem:[#allocation2 + $0x60] sm:$0xff] %vm299_vm1, %v621_v12  ;;  %v593_v34 = vld [vmem:[#allocation2] sm:$0xff]  ;;  %v591_v29 = vmul.f32 %v1846_v55, %v1770_v15 }
  0x43   : > { %v609_v42 = vadd.f32 %v593_v34, %v577_v0  ;;  %v597_v43 = vld [vmem:[#allocation2 + $0x20] sm:$0xff]  ;;  %558 = vst.msk [vmem:[#allocation2 + $0x70] sm:$0xff] %vm299_vm1, %v542_v39  ;;  %v619_v0 = vadd.f32 %v603_v62, %v587_v47  ;;  %v1874_v47 = vld [vmem:[%s1583_s11 + $0x51] sm:$0xff] }
  0x44   : > { %v613_v50 = vadd.f32 %v597_v43, %v581_v13  ;;  %v1853_v60 = vld [vmem:[%s1583_s11 + $0x21] sm:$0xff]  ;;  %549 = vst.msk [vmem:[#allocation2 + $0x28] sm:$0xff] %vm299_vm1, %v533_v56 }
  0x45   : > { %625 = vst.msk [vmem:[#allocation2] sm:$0xff] %vm299_vm1, %v609_v42  ;;  %v602_v30 = vld [vmem:[#allocation2 + $0x48] sm:$0xff]  ;;  %v578_v19 = vmul.f32 %v1853_v60, %v1770_v15  ;;  %v1859_v13 = vld [vmem:[%s1583_s11 + $0x1a] sm:$0xff] }
  0x46   : > { %629 = vst.msk [vmem:[#allocation2 + $0x20] sm:$0xff] %vm299_vm1, %v613_v50  ;;  %v618_v58 = vadd.f32 %v602_v30, %v586_v36  ;;  %v606_v63 = vld [vmem:[#allocation2 + $0x68] sm:$0xff]  ;;  %v658_v34 = vmul.f32 %v1859_v13, %v1824_v23  ;;  %v1878_v50 = vperm.slane %v1575_v1, 6 }
  0x47   : > { %v622_v16 = vadd.f32 %v606_v63, %v590_v51  ;;  %v1867_v36 = vld [vmem:[%s1583_s11 + $0x4a] sm:$0xff]  ;;  %635 = vst.msk [vmem:[#allocation2 + $0x50] sm:$0xff] %vm299_vm1, %v619_v0  ;;  %v1881_v51 = vld [vmem:[%s1583_s11 + $0x82] sm:$0xff]  ;;  %v1889_v0 = vld [vmem:[%s1583_s11 + $0xb2] sm:$0xff] }
  0x48   : > { %v682_v12 = vld [vmem:[#allocation2 + $0x40] sm:$0xff]  ;;  %634 = vst.msk [vmem:[#allocation2 + $0x48] sm:$0xff] %vm299_vm1, %v618_v58  ;;  %v662_v42 = vmul.f32 %v1867_v36, %v1824_v23  ;;  %v594_v43 = vld [vmem:[#allocation2 + $0x8] sm:$0xff] }
  0x49   : > { %v698_v31 = vadd.f32 %v682_v12, %v666_v54  ;;  %v686_v32 = vld [vmem:[#allocation2 + $0x60] sm:$0xff]  ;;  %638 = vst.msk [vmem:[#allocation2 + $0x68] sm:$0xff] %vm299_vm1, %v622_v16  ;;  %v610_v52 = vadd.f32 %v594_v43, %v578_v19  ;;  %v582_v54 = vmul.f32 %v1874_v47, %v1770_v15  ;;  %v668_v19 = vmul.f32 %v1675_v41, %v1824_v23 }
  0x4a   : > { %v702_v39 = vadd.f32 %v686_v32, %v670_v5  ;;  %v607_v30 = vld [vmem:[#allocation2 + $0x70] sm:$0xff]  ;;  %v667_v5 = vmul.f32 %v1881_v51, %v1824_v23  ;;  %v671_v16 = vmul.f32 %v1889_v0, %v1824_v23  ;;  %v1900_v32 = vld [vmem:[%s1583_s11 + $0xc2] sm:$0xff]  ;;  %v752_v43 = vmul.f32 %v1792_v46, %v1878_v50 }
  0x4b   : > { %714 = vst.msk [vmem:[#allocation2 + $0x40] sm:$0xff] %vm299_vm1, %v698_v31  ;;  %v623_v58 = vadd.f32 %v607_v30, %v591_v29  ;;  %v598_v31 = vld [vmem:[#allocation2 + $0x28] sm:$0xff]  ;;  %v748_v29 = vmul.f32 %v1594_v6, %v1878_v50  ;;  %v672_v46 = vmul.f32 %v1900_v32, %v1824_v23 }
  0x4c   : > { %718 = vst.msk [vmem:[#allocation2 + $0x60] sm:$0xff] %vm299_vm1, %v702_v39  ;;  %v674_v56 = vld [vmem:[#allocation2] sm:$0xff]  ;;  %v614_v39 = vadd.f32 %v598_v31, %v582_v54 }
  0x4d   : > { %v690_v62 = vadd.f32 %v674_v56, %v658_v34  ;;  %v678_v63 = vld [vmem:[#allocation2 + $0x20] sm:$0xff]  ;;  %626 = vst.msk [vmem:[#allocation2 + $0x8] sm:$0xff] %vm299_vm1, %v610_v52 }
  0x4e   : > { %v694_v12 = vadd.f32 %v678_v63, %v662_v42  ;;  %639 = vst.msk [vmem:[#allocation2 + $0x70] sm:$0xff] %vm299_vm1, %v623_v58  ;;  %v1907_v52 = vld [vmem:[%s1583_s11 + $0x22] sm:$0xff]  ;;  %v684_v30 = vld [vmem:[#allocation2 + $0x50] sm:$0xff] }
  0x4f   : > { %706 = vst.msk [vmem:[#allocation2] sm:$0xff] %vm299_vm1, %v690_v62  ;;  %v683_v34 = vld [vmem:[#allocation2 + $0x48] sm:$0xff]  ;;  %v659_v6 = vmul.f32 %v1907_v52, %v1824_v23  ;;  %v700_v58 = vadd.f32 %v684_v30, %v668_v19 }
  0x50   : > { %710 = vst.msk [vmem:[#allocation2 + $0x20] sm:$0xff] %vm299_vm1, %v694_v12  ;;  %v699_v42 = vadd.f32 %v683_v34, %v667_v5  ;;  %v687_v56 = vld [vmem:[#allocation2 + $0x68] sm:$0xff]  ;;  %v740_v12 = vmul.f32 %v1622_v17, %v1878_v50  ;;  %v744_v34 = vmul.f32 %v1878_v50, %v1586_v3  ;;  %v749_v3 = vmul.f32 %v1646_v26, %v1878_v50 }
  0x51   : > { %630 = vst.msk [vmem:[#allocation2 + $0x28] sm:$0xff] %vm299_vm1, %v614_v39  ;;  %v703_v54 = vadd.f32 %v687_v56, %v671_v16  ;;  %v1922_v39 = vld [vmem:[%s1583_s11 + $0x52] sm:$0xff]  ;;  %v1926_v16 = vperm.slane %v1575_v1, 7  ;;  %v750_v1 = vmul.f32 %v1605_v10, %v1878_v50 }
  0x52   : > { %v764_v62 = vld [vmem:[#allocation2 + $0x40] sm:$0xff]  ;;  %715 = vst.msk [vmem:[#allocation2 + $0x48] sm:$0xff] %vm299_vm1, %v699_v42  ;;  %v663_v42 = vmul.f32 %v1922_v39, %v1824_v23 }
  0x53   : > { %v780_v63 = vadd.f32 %v764_v62, %v748_v29  ;;  %v768_v5 = vld [vmem:[#allocation2 + $0x60] sm:$0xff]  ;;  %716 = vst.msk [vmem:[#allocation2 + $0x50] sm:$0xff] %vm299_vm1, %v700_v58  ;;  %v829_v26 = vmul.f32 %v1615_v14, %v1926_v16  ;;  %v265_v14 = vld [vmem:[%s2298_s1 + $0x8] sm:$0x1] }
  0x54   : > { %v784_v31 = vadd.f32 %v768_v5, %v752_v43  ;;  %719 = vst.msk [vmem:[#allocation2 + $0x68] sm:$0xff] %vm299_vm1, %v703_v54  ;;  %v675_v19 = vld [vmem:[#allocation2 + $0x8] sm:$0xff] }
  0x55   : > { %796 = vst.msk [vmem:[#allocation2 + $0x40] sm:$0xff] %vm299_vm1, %v780_v63  ;;  %v691_v29 = vadd.f32 %v675_v19, %v659_v6  ;;  %v688_v30 = vld [vmem:[#allocation2 + $0x70] sm:$0xff]  ;;  %v1934_v54 = vld [vmem:[%s1583_s11 + $0xc8] sm:$0xff]  ;;  %v833_v19 = vmul.f32 %v1846_v55, %v1926_v16 }
  0x56   : > { %800 = vst.msk [vmem:[#allocation2 + $0x60] sm:$0xff] %vm299_vm1, %v784_v31  ;;  %v756_v43 = vld [vmem:[#allocation2] sm:$0xff]  ;;  %v704_v56 = vadd.f32 %v688_v30, %v672_v46  ;;  %v753_v63 = vmul.f32 %v1934_v54, %v1878_v50  ;;  %v1360_v31 = vld [vmem:[%s1583_s11 + $0xd8] sm:$0xff]  ;;  %v741_v30 = vmul.f32 %v1687_v48, %v1878_v50 }
  0x57   : > { %v772_v58 = vadd.f32 %v756_v43, %v740_v12  ;;  %v760_v62 = vld [vmem:[#allocation2 + $0x20] sm:$0xff]  ;;  %707 = vst.msk [vmem:[#allocation2 + $0x8] sm:$0xff] %vm299_vm1, %v691_v29  ;;  %v754_v55 = vmul.f32 %v1360_v31, %v1878_v50 }
  0x58   : > { %v776_v6 = vadd.f32 %v760_v62, %v744_v34  ;;  %v679_v5 = vld [vmem:[#allocation2 + $0x28] sm:$0xff]  ;;  %720 = vst.msk [vmem:[#allocation2 + $0x70] sm:$0xff] %vm299_vm1, %v704_v56  ;;  %v821_v62 = vmul.f32 %v1643_v25, %v1926_v16 }
  0x59   : > { %788 = vst.msk [vmem:[#allocation2] sm:$0xff] %vm299_vm1, %v772_v58  ;;  %v765_v46 = vld [vmem:[#allocation2 + $0x48] sm:$0xff]  ;;  %v695_v12 = vadd.f32 %v679_v5, %v663_v42 }
  0x5a   : > { %792 = vst.msk [vmem:[#allocation2 + $0x20] sm:$0xff] %vm299_vm1, %v776_v6  ;;  %v781_v10 = vadd.f32 %v765_v46, %v749_v3  ;;  %v766_v34 = vld [vmem:[#allocation2 + $0x50] sm:$0xff] }
  0x5b   : > { %v769_v29 = vld [vmem:[#allocation2 + $0x68] sm:$0xff]  ;;  %711 = vst.msk [vmem:[#allocation2 + $0x28] sm:$0xff] %vm299_vm1, %v695_v12  ;;  %v782_v43 = vadd.f32 %v766_v34, %v750_v1  ;;  %v825_v1 = vmul.f32 %v1926_v16, %v1608_v11 }
  0x5c   : > { %v845_v42 = vld [vmem:[#allocation2 + $0x40] sm:$0xff]  ;;  %797 = vst.msk [vmem:[#allocation2 + $0x48] sm:$0xff] %vm299_vm1, %v781_v10  ;;  %v785_v56 = vadd.f32 %v769_v29, %v753_v63  ;;  %v1964_v63 = vperm.slane %v265_v14, 0  ;;  %v1972_v29 = vld [vmem:[%s1583_s11 + $0xc9] sm:$0xff] }
  0x5d   : > { %v861_v58 = vadd.f32 %v845_v42, %v829_v26  ;;  %v849_v3 = vld [vmem:[#allocation2 + $0x60] sm:$0xff]  ;;  %798 = vst.msk [vmem:[#allocation2 + $0x50] sm:$0xff] %vm299_vm1, %v782_v43  ;;  %v745_v26 = vmul.f32 %v1878_v50, %v1634_v21  ;;  %v834_v21 = vmul.f32 %v1972_v29, %v1926_v16 }
  0x5e   : > { %v865_v6 = vadd.f32 %v849_v3, %v833_v19  ;;  %801 = vst.msk [vmem:[#allocation2 + $0x68] sm:$0xff] %vm299_vm1, %v785_v56  ;;  %v757_v5 = vld [vmem:[#allocation2 + $0x8] sm:$0xff]  ;;  %v830_v19 = vmul.f32 %v1668_v38, %v1926_v16  ;;  %v910_v38 = vmul.f32 %v1675_v41, %v1964_v63 }
  0x5f   : > { %877 = vst.msk [vmem:[#allocation2 + $0x40] sm:$0xff] %vm299_vm1, %v861_v58  ;;  %v773_v46 = vadd.f32 %v757_v5, %v741_v30  ;;  %v770_v12 = vld [vmem:[#allocation2 + $0x70] sm:$0xff]  ;;  %v831_v30 = vmul.f32 %v1683_v45, %v1926_v16  ;;  %v914_v58 = vmul.f32 %v1900_v32, %v1964_v63  ;;  %v902_v32 = vmul.f32 %v1704_v61, %v1964_v63 }
  0x60   : > { %881 = vst.msk [vmem:[#allocation2 + $0x60] sm:$0xff] %vm299_vm1, %v865_v6  ;;  %v837_v31 = vld [vmem:[#allocation2] sm:$0xff]  ;;  %v786_v11 = vadd.f32 %v770_v12, %v754_v55  ;;  %v822_v6 = vmul.f32 %v1710_v8, %v1926_v16 }
  0x61   : > { %v853_v10 = vadd.f32 %v837_v31, %v821_v62  ;;  %v841_v34 = vld [vmem:[#allocation2 + $0x20] sm:$0xff]  ;;  %789 = vst.msk [vmem:[#allocation2 + $0x8] sm:$0xff] %vm299_vm1, %v773_v46 }
  0x62   : > { %v857_v43 = vadd.f32 %v841_v34, %v825_v1  ;;  %v761_v14 = vld [vmem:[#allocation2 + $0x28] sm:$0xff]  ;;  %802 = vst.msk [vmem:[#allocation2 + $0x70] sm:$0xff] %vm299_vm1, %v786_v11  ;;  %v1376_v55 = vld [vmem:[%s1583_s11 + $0xd9] sm:$0xff]  ;;  %v826_v34 = vmul.f32 %v1926_v16, %v1657_v33  ;;  %v335_v33 = vmul.f32 %v1805_v57, %v1602_v9 }
  0x63   : > { %869 = vst.msk [vmem:[#allocation2] sm:$0xff] %vm299_vm1, %v853_v10  ;;  %v846_v42 = vld [vmem:[#allocation2 + $0x48] sm:$0xff]  ;;  %v777_v56 = vadd.f32 %v761_v14, %v745_v26  ;;  %v835_v46 = vmul.f32 %v1376_v55, %v1926_v16 }
  0x64   : > { %873 = vst.msk [vmem:[#allocation2 + $0x20] sm:$0xff] %vm299_vm1, %v857_v43  ;;  %v862_v45 = vadd.f32 %v846_v42, %v830_v19  ;;  %v847_v3 = vld [vmem:[#allocation2 + $0x50] sm:$0xff]  ;;  %v906_v19 = vmul.f32 %v1964_v63, %v1672_v40 }
  0x65   : > { %v850_v62 = vld [vmem:[#allocation2 + $0x68] sm:$0xff]  ;;  %793 = vst.msk [vmem:[#allocation2 + $0x28] sm:$0xff] %vm299_vm1, %v777_v56  ;;  %v863_v1 = vadd.f32 %v847_v3, %v831_v30  ;;  %v912_v56 = vmul.f32 %v1745_v49, %v1964_v63  ;;  %v351_v3 = vld [vmem:[#allocation2 + $0x10] sm:$0xff] }
  0x66   : > { %v926_v41 = vld [vmem:[#allocation2 + $0x40] sm:$0xff]  ;;  %878 = vst.msk [vmem:[#allocation2 + $0x48] sm:$0xff] %vm299_vm1, %v862_v45  ;;  %v866_v5 = vadd.f32 %v850_v62, %v834_v21  ;;  %v911_v21 = vmul.f32 %v1728_v28, %v1964_v63  ;;  %v2005_v42 = vld [vmem:[%s1583_s11 + $0xca] sm:$0xff] }
  0x67   : > { %v942_v26 = vadd.f32 %v926_v41, %v910_v38  ;;  %v930_v12 = vld [vmem:[#allocation2 + $0x60] sm:$0xff]  ;;  %879 = vst.msk [vmem:[#allocation2 + $0x50] sm:$0xff] %vm299_vm1, %v863_v1 }
  0x68   : > { %v946_v31 = vadd.f32 %v930_v12, %v914_v58  ;;  %882 = vst.msk [vmem:[#allocation2 + $0x68] sm:$0xff] %vm299_vm1, %v866_v5  ;;  %v838_v11 = vld [vmem:[#allocation2 + $0x8] sm:$0xff]  ;;  %v915_v58 = vmul.f32 %v2005_v42, %v1964_v63  ;;  %v2018_v62 = vld [vmem:[%s2299_s2] ss:$0 sm:$0xff]  ;;  %v367_v12 = vadd.f32 %v351_v3, %v335_v33 }
  0x69   : > { %958 = vst.msk [vmem:[#allocation2 + $0x40] sm:$0xff] %vm299_vm1, %v942_v26  ;;  %v854_v10 = vadd.f32 %v838_v11, %v822_v6  ;;  %v851_v30 = vld [vmem:[#allocation2 + $0x70] sm:$0xff]  ;;  %v1392_v1 = vld [vmem:[%s1583_s11 + $0xda] sm:$0xff]  ;;  %v289_v11 = vmul.f32 %v1762_v4, %v1578_v2 }
  0x6a   : > { %962 = vst.msk [vmem:[#allocation2 + $0x60] sm:$0xff] %vm299_vm1, %v946_v31  ;;  %v918_v43 = vld [vmem:[#allocation2] sm:$0xff]  ;;  %v867_v14 = vadd.f32 %v851_v30, %v835_v46  ;;  %v903_v46 = vmul.f32 %v1755_v59, %v1964_v63 }
  0x6b   : > { %v934_v38 = vadd.f32 %v918_v43, %v902_v32  ;;  %v922_v40 = vld [vmem:[#allocation2 + $0x20] sm:$0xff]  ;;  %870 = vst.msk [vmem:[#allocation2 + $0x8] sm:$0xff] %vm299_vm1, %v854_v10 }
  0x6c   : > { %v938_v55 = vadd.f32 %v922_v40, %v906_v19  ;;  %v842_v45 = vld [vmem:[#allocation2 + $0x28] sm:$0xff]  ;;  %883 = vst.msk [vmem:[#allocation2 + $0x70] sm:$0xff] %vm299_vm1, %v867_v14  ;;  %v916_v19 = vmul.f32 %v1392_v1, %v1964_v63 }
  0x6d   : > { %950 = vst.msk [vmem:[#allocation2] sm:$0xff] %vm299_vm1, %v934_v38  ;;  %v927_v6 = vld [vmem:[#allocation2 + $0x48] sm:$0xff]  ;;  %v858_v49 = vadd.f32 %v842_v45, %v826_v34  ;;  %v907_v38 = vmul.f32 %v1964_v63, %v1714_v18 }
  0x6e   : > { %954 = vst.msk [vmem:[#allocation2 + $0x20] sm:$0xff] %vm299_vm1, %v938_v55  ;;  %v943_v57 = vadd.f32 %v927_v6, %v911_v21  ;;  %v928_v41 = vld [vmem:[#allocation2 + $0x50] sm:$0xff] }
  0x6f   : > { %v931_v5 = vld [vmem:[#allocation2 + $0x68] sm:$0xff]  ;;  %874 = vst.msk [vmem:[#allocation2 + $0x28] sm:$0xff] %vm299_vm1, %v858_v49  ;;  %v944_v26 = vadd.f32 %v928_v41, %v912_v56 }
  0x70   : > { %v975_v32 = vld [vmem:[#allocation2 + $0x40] sm:$0xff]  ;;  %959 = vst.msk [vmem:[#allocation2 + $0x48] sm:$0xff] %vm299_vm1, %v943_v57  ;;  %v947_v31 = vadd.f32 %v931_v5, %v915_v58  ;;  %v416_v57 = vmul.f32 %v1859_v13, %v1665_v37 }
  0x71   : > { %v994_v10 = vadd.f32 %v2018_v62, %v975_v32  ;;  %v979_v34 = vld [vmem:[#allocation2 + $0x60] sm:$0xff]  ;;  %960 = vst.msk [vmem:[#allocation2 + $0x50] sm:$0xff] %vm299_vm1, %v944_v26  ;;  %v339_v26 = vmul.f32 %v1813_v7, %v1602_v9 }
  0x72   : > { %v998_v30 = vadd.f32 %v2018_v62, %v979_v34  ;;  %963 = vst.msk [vmem:[#allocation2 + $0x68] sm:$0xff] %vm299_vm1, %v947_v31  ;;  %v919_v43 = vld [vmem:[#allocation2 + $0x8] sm:$0xff] }
  0x73   : > { %v1010_v21 = vmax.f32 %v994_v10, 0.0  ;;  %v935_v14 = vadd.f32 %v919_v43, %v903_v46  ;;  %v932_v40 = vld [vmem:[#allocation2 + $0x70] sm:$0xff]  ;;  %383 = vst.msk [vmem:[#allocation2 + $0x10] sm:$0xff] %vm299_vm1, %v367_v12 }
  0x74   : > { %v1014_v56 = vmax.f32 %v998_v30, 0.0  ;;  %v967_v33 = vld [vmem:[#allocation2] sm:$0xff]  ;;  %v948_v55 = vadd.f32 %v932_v40, %v916_v19  ;;  %306 = vst.msk [vmem:[#allocation2 + $0x30] sm:$0xff] %vm299_vm1, %v289_v11 }
  0x75   : > { %1026 = vst.msk [vmem:[#allocation2 + $0x40] sm:$0xff] %vm299_vm1, %v1010_v21  ;;  %v986_v58 = vadd.f32 %v2018_v62, %v967_v33  ;;  %v971_v45 = vld [vmem:[#allocation2 + $0x20] sm:$0xff] }
  0x76   : > { %1030 = vst.msk [vmem:[#allocation2 + $0x60] sm:$0xff] %vm299_vm1, %v1014_v56  ;;  %v990_v3 = vadd.f32 %v2018_v62, %v971_v45  ;;  %v923_v6 = vld [vmem:[#allocation2 + $0x28] sm:$0xff]  ;;  %v298_v56 = vmul.f32 %v1781_v35, %v1578_v2 }
  0x77   : > { %v1002_v49 = vmax.f32 %v986_v58, 0.0  ;;  %v976_v18 = vld [vmem:[#allocation2 + $0x48] sm:$0xff]  ;;  %951 = vst.msk [vmem:[#allocation2 + $0x8] sm:$0xff] %vm299_vm1, %v935_v14  ;;  %v939_v1 = vadd.f32 %v923_v6, %v907_v38  ;;  %v294_v38 = vmul.f32 %v1773_v20, %v1578_v2  ;;  %v286_v6 = vmul.f32 %v1799_v53, %v1578_v2 }
  0x78   : > { %v1006_v41 = vmax.f32 %v990_v3, 0.0  ;;  %v995_v5 = vadd.f32 %v2018_v62, %v976_v18  ;;  %v977_v46 = vld [vmem:[#allocation2 + $0x50] sm:$0xff]  ;;  %964 = vst.msk [vmem:[#allocation2 + $0x70] sm:$0xff] %vm299_vm1, %v948_v55  ;;  %v420_v53 = vmul.f32 %v1867_v36, %v1665_v37 }
  0x79   : > { %1018 = vst.msk [vmem:[#allocation2] sm:$0xff] %vm299_vm1, %v1002_v49  ;;  %v980_v12 = vld [vmem:[#allocation2 + $0x68] sm:$0xff]  ;;  %v996_v32 = vadd.f32 %v2018_v62, %v977_v46 }
  0x7a   : > { %1022 = vst.msk [vmem:[#allocation2 + $0x20] sm:$0xff] %vm299_vm1, %v1006_v41  ;;  %v1011_v31 = vmax.f32 %v995_v5, 0.0  ;;  %v999_v19 = vadd.f32 %v2018_v62, %v980_v12  ;;  %v432_v13 = vld [vmem:[#allocation2 + $0x10] sm:$0xff]  ;;  %v498_v5 = vmul.f32 %v1622_v17, %v1725_v27  ;;  %v348_v17 = vmul.f32 %v1835_v44, %v1602_v9 }
  0x7b   : > { %955 = vst.msk [vmem:[#allocation2 + $0x28] sm:$0xff] %vm299_vm1, %v939_v1  ;;  %v1012_v11 = vmax.f32 %v996_v32, 0.0  ;;  %v448_v10 = vadd.f32 %v432_v13, %v416_v57  ;;  %v355_v34 = vld [vmem:[#allocation2 + $0x30] sm:$0xff]  ;;  %v290_v1 = vmul.f32 %v1820_v22, %v1578_v2  ;;  %v344_v2 = vmul.f32 %v1827_v24, %v1602_v9 }
  0x7c   : > { %v1042_v30 = vld [vmem:[#allocation2 + $0x40] sm:$0xff]  ;;  %1027 = vst.msk [vmem:[#allocation2 + $0x48] sm:$0xff] %vm299_vm1, %v1011_v31  ;;  %v1015_v43 = vmax.f32 %v999_v19, 0.0  ;;  %v371_v21 = vadd.f32 %v355_v34, %v339_v26 }
  0x7d   : > { %1403 = vmatmul.msk.f32.vlgmr.msra.gmra.mxu2 %vm299_vm1, %v1042_v30  ;;  %v1046_v14 = vld [vmem:[#allocation2 + $0x60] sm:$0xff]  ;;  %1028 = vst.msk [vmem:[#allocation2 + $0x50] sm:$0xff] %vm299_vm1, %v1012_v11 }
  0x7e   : > { %1407 = vmatmul.msk.f32.vlgmr.msra.gmra.mxu3 %vm299_vm1, %v1046_v14  ;;  %1031 = vst.msk [vmem:[#allocation2 + $0x68] sm:$0xff] %vm299_vm1, %v1015_v43  ;;  %v968_v40 = vld [vmem:[#allocation2 + $0x8] sm:$0xff] }
  0x7f   : > { %v987_v33 = vadd.f32 %v2018_v62, %v968_v40  ;;  %v981_v55 = vld [vmem:[#allocation2 + $0x70] sm:$0xff]  ;;  %464 = vst.msk [vmem:[#allocation2 + $0x10] sm:$0xff] %vm299_vm1, %v448_v10  ;;  %v336_v10 = vmul.f32 %v1853_v60, %v1602_v9  ;;  %v579_v60 = vmul.f32 %v1643_v25, %v1770_v15  ;;  %v429_v25 = vmul.f32 %v1889_v0, %v1665_v37 }
  0x80   : > { %v1034_v58 = vld [vmem:[#allocation2] sm:$0xff]  ;;  %v1000_v45 = vadd.f32 %v2018_v62, %v981_v55  ;;  %387 = vst.msk [vmem:[#allocation2 + $0x30] sm:$0xff] %vm299_vm1, %v371_v21  ;;  %v340_v21 = vmul.f32 %v1874_v47, %v1602_v9 }
  0x81   : > { %1395 = vmatmul.msk.f32.vlgmr.msra.gmra.mxu0 %vm299_vm1, %v1034_v58  ;;  %v1038_v20 = vld [vmem:[#allocation2 + $0x20] sm:$0xff]  ;;  %v1003_v3 = vmax.f32 %v987_v33, 0.0  ;;  %311 = vst.msk [vmem:[#allocation2 + $0x58] sm:$0xff] %vm299_vm1, %v294_v38 }
  0x82   : > { %1399 = vmatmul.msk.f32.vlgmr.msra.gmra.mxu1 %vm299_vm1, %v1038_v20  ;;  %v972_v49 = vld [vmem:[#allocation2 + $0x28] sm:$0xff]  ;;  %v1016_v18 = vmax.f32 %v1000_v45, 0.0  ;;  %315 = vst.msk [vmem:[#allocation2 + $0x78] sm:$0xff] %vm299_vm1, %v298_v56  ;;  %v1304_v38 = vld [vmem:[%s1583_s11 + $0x60] sm:$0xff]  ;;  %v425_v45 = vmul.f32 %v1881_v51, %v1665_v37  ;;  %v417_v51 = vmul.f32 %v1907_v52, %v1665_v37 }
  0x83   : > { %v1043_v57 = vld [vmem:[#allocation2 + $0x48] sm:$0xff]  ;;  %1019 = vst.msk [vmem:[#allocation2 + $0x8] sm:$0xff] %vm299_vm1, %v1003_v3  ;;  %v991_v41 = vadd.f32 %v2018_v62, %v972_v49  ;;  %v502_v9 = vmul.f32 %v1304_v38, %v1725_v27 }
  0x84   : > { %1032 = vst.msk [vmem:[#allocation2 + $0x70] sm:$0xff] %vm299_vm1, %v1016_v18  ;;  %v1044_v30 = vld [vmem:[#allocation2 + $0x50] sm:$0xff] }
  0x85   : > { %1404 = vmatmul.msk.f32.gmra.mxu2 %vm299_vm1, %v1043_v57  ;;  %v1047_v46 = vld [vmem:[#allocation2 + $0x68] sm:$0xff]  ;;  %v1007_v26 = vmax.f32 %v991_v41, 0.0  ;;  %303 = vst.msk [vmem:[#allocation2 + $0x18] sm:$0xff] %vm299_vm1, %v286_v6 }
  0x86   : > { %1408 = vmatmul.msk.f32.gmra.mxu3 %vm299_vm1, %v1047_v46  ;;  %v514_v12 = vld [vmem:[#allocation2 + $0x10] sm:$0xff]  ;;  %307 = vst.msk [vmem:[#allocation2 + $0x38] sm:$0xff] %vm299_vm1, %v290_v1 }
  0x87   : > { %1023 = vst.msk [vmem:[#allocation2 + $0x28] sm:$0xff] %vm299_vm1, %v1007_v26  ;;  %v530_v32 = vadd.f32 %v514_v12, %v498_v5  ;;  %v436_v31 = vld [vmem:[#allocation2 + $0x30] sm:$0xff]  ;;  %v421_v5 = vmul.f32 %v1922_v39, %v1665_v37  ;;  %v660_v26 = vmul.f32 %v1704_v61, %v1824_v23  ;;  %v1305_v61 = vld [vmem:[%s1583_s11 + $0x68] sm:$0xff] }
  0x88   : > { %v452_v19 = vadd.f32 %v436_v31, %v420_v53  ;;  %v360_v13 = vld [vmem:[#allocation2 + $0x58] sm:$0xff]  ;;  %v1320_v53 = vld [vmem:[%s1583_s11 + $0x61] sm:$0xff] }
  0x89   : > { %546 = vst.msk [vmem:[#allocation2 + $0x10] sm:$0xff] %vm299_vm1, %v530_v32  ;;  %v376_v24 = vadd.f32 %v360_v13, %v344_v2  ;;  %v364_v11 = vld [vmem:[#allocation2 + $0x78] sm:$0xff]  ;;  %v583_v52 = vmul.f32 %v1320_v53, %v1770_v15 }
  0x8a   : > { %v1035_v34 = vld [vmem:[#allocation2 + $0x8] sm:$0xff]  ;;  %468 = vst.msk [vmem:[#allocation2 + $0x30] sm:$0xff] %vm299_vm1, %v452_v19  ;;  %v380_v43 = vadd.f32 %v364_v11, %v348_v17  ;;  %v1460_v32 = vld [vmem:[%s1583_s11 + $0x98] sm:$0xff]  ;;  %v511_v19 = vmul.f32 %v1934_v54, %v1725_v27  ;;  %v503_v54 = vmul.f32 %v1305_v61, %v1725_v27  ;;  %v904_v61 = vmul.f32 %v1867_v36, %v1964_v63 }
  0x8b   : > { %1396 = vmatmul.msk.f32.gmra.mxu0 %vm299_vm1, %v1035_v34  ;;  %v1048_v14 = vld [vmem:[#allocation2 + $0x70] sm:$0xff]  ;;  %392 = vst.msk [vmem:[#allocation2 + $0x58] sm:$0xff] %vm299_vm1, %v376_v24  ;;  %v507_v31 = vmul.f32 %v1460_v32, %v1725_v27 }
  0x8c   : > { %396 = vst.msk [vmem:[#allocation2 + $0x78] sm:$0xff] %vm299_vm1, %v380_v43  ;;  %v352_v40 = vld [vmem:[#allocation2 + $0x18] sm:$0xff]  ;;  %v499_v43 = vmul.f32 %v1687_v48, %v1725_v27 }
  0x8d   : > { %1405 = vmatmul.msk.f32.gmra.mxu2 %vm299_vm1, %v1044_v30  ;;  %v368_v56 = vadd.f32 %v352_v40, %v336_v10  ;;  %v356_v33 = vld [vmem:[#allocation2 + $0x38] sm:$0xff]  ;;  %v742_v40 = vmul.f32 %v1762_v4, %v1878_v50  ;;  %v1321_v4 = vld [vmem:[%s1583_s11 + $0x69] sm:$0xff] }
  0x8e   : > { %v1039_v55 = vld [vmem:[#allocation2 + $0x28] sm:$0xff]  ;;  %1409 = vmatmul.msk.f32.gmra.mxu3 %vm299_vm1, %v1048_v14  ;;  %v372_v58 = vadd.f32 %v356_v33, %v340_v21 }
  0x8f   : > { %1400 = vmatmul.msk.f32.gmra.mxu1 %vm299_vm1, %v1039_v55  ;;  %384 = vst.msk [vmem:[#allocation2 + $0x18] sm:$0xff] %vm299_vm1, %v368_v56  ;;  %v1336_v14 = vld [vmem:[%s1583_s11 + $0x62] sm:$0xff]  ;;  %v1461_v55 = vld [vmem:[%s1583_s11 + $0x99] sm:$0xff] }
  0x90   : > { %v595_v20 = vld [vmem:[#allocation2 + $0x10] sm:$0xff]  ;;  %388 = vst.msk [vmem:[#allocation2 + $0x38] sm:$0xff] %vm299_vm1, %v372_v58  ;;  %v664_v33 = vmul.f32 %v1336_v14, %v1824_v23  ;;  %v592_v58 = vmul.f32 %v1972_v29, %v1770_v15  ;;  %v1352_v29 = vld [vmem:[%s1583_s11 + $0x78] sm:$0xff]  ;;  %v1353_v14 = vld [vmem:[%s1583_s11 + $0x80] sm:$0xff] }
  0x91   : > { %v611_v3 = vadd.f32 %v595_v20, %v579_v60  ;;  %v518_v6 = vld [vmem:[#allocation2 + $0x30] sm:$0xff] }
  0x92   : > { %v534_v49 = vadd.f32 %v518_v6, %v502_v9  ;;  %v441_v18 = vld [vmem:[#allocation2 + $0x58] sm:$0xff]  ;;  %v588_v9 = vmul.f32 %v1461_v55, %v1770_v15 }
  0x93   : > { %627 = vst.msk [vmem:[#allocation2 + $0x10] sm:$0xff] %vm299_vm1, %v611_v3  ;;  %v457_v1 = vadd.f32 %v441_v18, %v425_v45  ;;  %v445_v57 = vld [vmem:[#allocation2 + $0x78] sm:$0xff]  ;;  %v580_v18 = vmul.f32 %v1710_v8, %v1770_v15 }
  0x94   : > { %550 = vst.msk [vmem:[#allocation2 + $0x30] sm:$0xff] %vm299_vm1, %v534_v49  ;;  %v461_v41 = vadd.f32 %v445_v57, %v429_v25  ;;  %v584_v57 = vmul.f32 %v1321_v4, %v1770_v15  ;;  %v1384_v55 = vld [vmem:[%s1583_s11 + $0x7a] sm:$0xff] }
  0x95   : > { %473 = vst.msk [vmem:[#allocation2 + $0x58] sm:$0xff] %vm299_vm1, %v457_v1 }
  0x96   : > { %477 = vst.msk [vmem:[#allocation2 + $0x78] sm:$0xff] %vm299_vm1, %v461_v41  ;;  %v433_v46 = vld [vmem:[#allocation2 + $0x18] sm:$0xff]  ;;  %v823_v41 = vmul.f32 %v1813_v7, %v1926_v16  ;;  %v1337_v7 = vld [vmem:[%s1583_s11 + $0x6a] sm:$0xff] }
  0x97   : > { %v449_v2 = vadd.f32 %v433_v46, %v417_v51  ;;  %v437_v12 = vld [vmem:[#allocation2 + $0x38] sm:$0xff]  ;;  %v746_v46 = vmul.f32 %v1352_v29, %v1878_v50 }
  0x98   : > { %v453_v17 = vadd.f32 %v437_v12, %v421_v5 }
  0x99   : > { %465 = vst.msk [vmem:[#allocation2 + $0x18] sm:$0xff] %vm299_vm1, %v449_v2  ;;  %v673_v2 = vmul.f32 %v2005_v42, %v1824_v23  ;;  %v665_v42 = vmul.f32 %v1337_v7, %v1824_v23 }
  0x9a   : > { %v676_v37 = vld [vmem:[#allocation2 + $0x10] sm:$0xff]  ;;  %469 = vst.msk [vmem:[#allocation2 + $0x38] sm:$0xff] %vm299_vm1, %v453_v17 }
  0x9b   : > { %v692_v13 = vadd.f32 %v676_v37, %v660_v26  ;;  %v599_v24 = vld [vmem:[#allocation2 + $0x30] sm:$0xff]  ;;  %v669_v26 = vmul.f32 %v1728_v28, %v1824_v23  ;;  %v661_v28 = vmul.f32 %v1755_v59, %v1824_v23 }
  0x9c   : > { %v615_v11 = vadd.f32 %v599_v24, %v583_v52  ;;  %v523_v10 = vld [vmem:[#allocation2 + $0x58] sm:$0xff] }
  0x9d   : > { %708 = vst.msk [vmem:[#allocation2 + $0x10] sm:$0xff] %vm299_vm1, %v692_v13  ;;  %v539_v34 = vadd.f32 %v523_v10, %v507_v31  ;;  %v527_v30 = vld [vmem:[#allocation2 + $0x78] sm:$0xff] }
  0x9e   : > { %631 = vst.msk [vmem:[#allocation2 + $0x30] sm:$0xff] %vm299_vm1, %v615_v11  ;;  %v543_v21 = vadd.f32 %v527_v30, %v511_v19  ;;  %v1368_v13 = vld [vmem:[%s1583_s11 + $0x79] sm:$0xff] }
  0x9f   : > { %555 = vst.msk [vmem:[#allocation2 + $0x58] sm:$0xff] %vm299_vm1, %v539_v34  ;;  %v1361_v11 = vld [vmem:[%s1583_s11 + $0xe0] sm:$0xff]  ;;  %v827_v59 = vmul.f32 %v1368_v13, %v1926_v16 }
  0xa0   : > { %559 = vst.msk [vmem:[#allocation2 + $0x78] sm:$0xff] %vm299_vm1, %v543_v21  ;;  %v515_v38 = vld [vmem:[#allocation2 + $0x18] sm:$0xff]  ;;  %v755_v21 = vmul.f32 %v1361_v11, %v1878_v50 }
  0xa1   : > { %v531_v60 = vadd.f32 %v515_v38, %v499_v43  ;;  %v519_v56 = vld [vmem:[#allocation2 + $0x38] sm:$0xff]  ;;  %v751_v43 = vmul.f32 %v1781_v35, %v1878_v50  ;;  %v743_v35 = vmul.f32 %v1820_v22, %v1878_v50  ;;  %v832_v22 = vmul.f32 %v1835_v44, %v1926_v16 }
  0xa2   : > { %v535_v48 = vadd.f32 %v519_v56, %v503_v54  ;;  %v824_v44 = vmul.f32 %v1874_v47, %v1926_v16  ;;  %v913_v47 = vmul.f32 %v1889_v0, %v1964_v63 }
  0xa3   : > { %547 = vst.msk [vmem:[#allocation2 + $0x18] sm:$0xff] %vm299_vm1, %v531_v60 }
  0xa4   : > { %v758_v27 = vld [vmem:[#allocation2 + $0x10] sm:$0xff]  ;;  %551 = vst.msk [vmem:[#allocation2 + $0x38] sm:$0xff] %vm299_vm1, %v535_v48  ;;  %v747_v48 = vmul.f32 %v1353_v14, %v1878_v50 }
  0xa5   : > { %v774_v45 = vadd.f32 %v758_v27, %v742_v40  ;;  %v680_v20 = vld [vmem:[#allocation2 + $0x30] sm:$0xff]  ;;  %v1377_v27 = vld [vmem:[%s1583_s11 + $0xe1] sm:$0xff] }
  0xa6   : > { %v696_v25 = vadd.f32 %v680_v20, %v664_v33  ;;  %v604_v3 = vld [vmem:[#allocation2 + $0x58] sm:$0xff]  ;;  %v908_v20 = vmul.f32 %v1384_v55, %v1964_v63  ;;  %v836_v50 = vmul.f32 %v1377_v27, %v1926_v16 }
  0xa7   : > { %790 = vst.msk [vmem:[#allocation2 + $0x10] sm:$0xff] %vm299_vm1, %v774_v45  ;;  %v620_v6 = vadd.f32 %v604_v3, %v588_v9  ;;  %v608_v49 = vld [vmem:[#allocation2 + $0x78] sm:$0xff] }
  0xa8   : > { %712 = vst.msk [vmem:[#allocation2 + $0x30] sm:$0xff] %vm299_vm1, %v696_v25  ;;  %v624_v1 = vadd.f32 %v608_v49, %v592_v58  ;;  %v1369_v49 = vld [vmem:[%s1583_s11 + $0x81] sm:$0xff] }
  0xa9   : > { %636 = vst.msk [vmem:[#allocation2 + $0x58] sm:$0xff] %vm299_vm1, %v620_v6 }
  0xaa   : > { %640 = vst.msk [vmem:[#allocation2 + $0x78] sm:$0xff] %vm299_vm1, %v624_v1  ;;  %v596_v51 = vld [vmem:[#allocation2 + $0x18] sm:$0xff] }
  0xab   : > { %v612_v5 = vadd.f32 %v596_v51, %v580_v18  ;;  %v600_v53 = vld [vmem:[#allocation2 + $0x38] sm:$0xff] }
  0xac   : > { %v616_v8 = vadd.f32 %v600_v53, %v584_v57 }
  0xad   : > { %628 = vst.msk [vmem:[#allocation2 + $0x18] sm:$0xff] %vm299_vm1, %v612_v5  ;;  %v828_v5 = vmul.f32 %v1369_v49, %v1926_v16 }
  0xae   : > { %v839_v15 = vld [vmem:[#allocation2 + $0x10] sm:$0xff]  ;;  %632 = vst.msk [vmem:[#allocation2 + $0x38] sm:$0xff] %vm299_vm1, %v616_v8 }
  0xaf   : > { %v855_v12 = vadd.f32 %v839_v15, %v823_v41  ;;  %v762_v52 = vld [vmem:[#allocation2 + $0x30] sm:$0xff] }
  0xb0   : > { %v778_v17 = vadd.f32 %v762_v52, %v746_v46  ;;  %v685_v32 = vld [vmem:[#allocation2 + $0x58] sm:$0xff] }
  0xb1   : > { %871 = vst.msk [vmem:[#allocation2 + $0x10] sm:$0xff] %vm299_vm1, %v855_v12  ;;  %v701_v31 = vadd.f32 %v685_v32, %v669_v26  ;;  %v689_v37 = vld [vmem:[#allocation2 + $0x78] sm:$0xff]  ;;  %v1393_v26 = vld [vmem:[%s1583_s11 + $0xe2] sm:$0xff]  ;;  %v905_v32 = vmul.f32 %v1922_v39, %v1964_v63 }
  0xb2   : > { %794 = vst.msk [vmem:[#allocation2 + $0x30] sm:$0xff] %vm299_vm1, %v778_v17  ;;  %v705_v19 = vadd.f32 %v689_v37, %v673_v2  ;;  %v917_v16 = vmul.f32 %v1393_v26, %v1964_v63  ;;  %v1385_v12 = vld [vmem:[%s1583_s11 + $0x82] sm:$0xff] }
  0xb3   : > { %717 = vst.msk [vmem:[#allocation2 + $0x58] sm:$0xff] %vm299_vm1, %v701_v31  ;;  %v909_v0 = vmul.f32 %v1385_v12, %v1964_v63 }
  0xb4   : > { %721 = vst.msk [vmem:[#allocation2 + $0x78] sm:$0xff] %vm299_vm1, %v705_v19  ;;  %v677_v24 = vld [vmem:[#allocation2 + $0x18] sm:$0xff] }
  0xb5   : > { %v693_v10 = vadd.f32 %v677_v24, %v661_v28  ;;  %v681_v34 = vld [vmem:[#allocation2 + $0x38] sm:$0xff] }
  0xb6   : > { %v697_v30 = vadd.f32 %v681_v34, %v665_v42 }
  0xb7   : > { %709 = vst.msk [vmem:[#allocation2 + $0x18] sm:$0xff] %vm299_vm1, %v693_v10 }
  0xb8   : > { %v920_v23 = vld [vmem:[#allocation2 + $0x10] sm:$0xff]  ;;  %713 = vst.msk [vmem:[#allocation2 + $0x38] sm:$0xff] %vm299_vm1, %v697_v30 }
  0xb9   : > { %v936_v54 = vadd.f32 %v920_v23, %v904_v61  ;;  %v843_v36 = vld [vmem:[#allocation2 + $0x30] sm:$0xff] }
  0xba   : > { %v859_v38 = vadd.f32 %v843_v36, %v827_v59  ;;  %v767_v40 = vld [vmem:[#allocation2 + $0x58] sm:$0xff] }
  0xbb   : > { %952 = vst.msk [vmem:[#allocation2 + $0x10] sm:$0xff] %vm299_vm1, %v936_v54  ;;  %v783_v60 = vadd.f32 %v767_v40, %v751_v43  ;;  %v771_v56 = vld [vmem:[#allocation2 + $0x78] sm:$0xff] }
  0xbc   : > { %875 = vst.msk [vmem:[#allocation2 + $0x30] sm:$0xff] %vm299_vm1, %v859_v38  ;;  %v787_v33 = vadd.f32 %v771_v56, %v755_v21  ;;  %v1459_v56 = vld [vmem:[%s2301_s4] ss:$0 sm:$0xff] }
  0xbd   : > { %799 = vst.msk [vmem:[#allocation2 + $0x58] sm:$0xff] %vm299_vm1, %v783_v60 }
  0xbe   : > { %803 = vst.msk [vmem:[#allocation2 + $0x78] sm:$0xff] %vm299_vm1, %v787_v33  ;;  %v759_v9 = vld [vmem:[#allocation2 + $0x18] sm:$0xff] }
  0xbf   : > { %v775_v58 = vadd.f32 %v759_v9, %v743_v35  ;;  %v763_v45 = vld [vmem:[#allocation2 + $0x38] sm:$0xff] }
  0xc0   : > { %v779_v4 = vadd.f32 %v763_v45, %v747_v48 }
  0xc1   : > { %791 = vst.msk [vmem:[#allocation2 + $0x18] sm:$0xff] %vm299_vm1, %v775_v58 }
  0xc2   : > { %v969_v25 = vld [vmem:[#allocation2 + $0x10] sm:$0xff]  ;;  %795 = vst.msk [vmem:[#allocation2 + $0x38] sm:$0xff] %vm299_vm1, %v779_v4 }
  0xc3   : > { %v988_v3 = vadd.f32 %v2018_v62, %v969_v25  ;;  %v924_v6 = vld [vmem:[#allocation2 + $0x30] sm:$0xff] }
  0xc4   : > { %v940_v18 = vadd.f32 %v924_v6, %v908_v20  ;;  %v848_v1 = vld [vmem:[#allocation2 + $0x58] sm:$0xff] }
  0xc5   : > { %v1004_v57 = vmax.f32 %v988_v3, 0.0  ;;  %v864_v29 = vadd.f32 %v848_v1, %v832_v22  ;;  %v852_v51 = vld [vmem:[#allocation2 + $0x78] sm:$0xff] }
  0xc6   : > { %956 = vst.msk [vmem:[#allocation2 + $0x30] sm:$0xff] %vm299_vm1, %v940_v18  ;;  %v868_v41 = vadd.f32 %v852_v51, %v836_v50 }
  0xc7   : > { %1020 = vst.msk [vmem:[#allocation2 + $0x10] sm:$0xff] %vm299_vm1, %v1004_v57 }
  0xc8   : > { %880 = vst.msk [vmem:[#allocation2 + $0x58] sm:$0xff] %vm299_vm1, %v864_v29  ;;  %v840_v53 = vld [vmem:[#allocation2 + $0x18] sm:$0xff] }
  0xc9   : > { %884 = vst.msk [vmem:[#allocation2 + $0x78] sm:$0xff] %vm299_vm1, %v868_v41  ;;  %v856_v46 = vadd.f32 %v840_v53, %v824_v44  ;;  %v844_v8 = vld [vmem:[#allocation2 + $0x38] sm:$0xff] }
  0xca   : > { %v860_v15 = vadd.f32 %v844_v8, %v828_v5 }
  0xcb   : > { %872 = vst.msk [vmem:[#allocation2 + $0x18] sm:$0xff] %vm299_vm1, %v856_v46 }
  0xcc   : > { %876 = vst.msk [vmem:[#allocation2 + $0x38] sm:$0xff] %vm299_vm1, %v860_v15 }
  0xcd   : > { %v973_v2 = vld [vmem:[#allocation2 + $0x30] sm:$0xff] }
  0xce   : > { %v1036_v52 = vld [vmem:[#allocation2 + $0x10] sm:$0xff]  ;;  %v992_v7 = vadd.f32 %v2018_v62, %v973_v2 }
  0xcf   : > { %1397 = vmatmul.msk.f32.gmra.mxu0 %vm299_vm1, %v1036_v52  ;;  %v929_v17 = vld [vmem:[#allocation2 + $0x58] sm:$0xff] }
  0xd0   : > { %v1008_v31 = vmax.f32 %v992_v7, 0.0  ;;  %v945_v37 = vadd.f32 %v929_v17, %v913_v47  ;;  %v933_v28 = vld [vmem:[#allocation2 + $0x78] sm:$0xff] }
  0xd1   : > { %v949_v19 = vadd.f32 %v933_v28, %v917_v16 }
  0xd2   : > { %1024 = vst.msk [vmem:[#allocation2 + $0x30] sm:$0xff] %vm299_vm1, %v1008_v31  ;;  %v921_v42 = vld [vmem:[#allocation2 + $0x18] sm:$0xff] }
  0xd3   : > { %961 = vst.msk [vmem:[#allocation2 + $0x58] sm:$0xff] %vm299_vm1, %v945_v37  ;;  %v937_v13 = vadd.f32 %v921_v42, %v905_v32  ;;  %v925_v24 = vld [vmem:[#allocation2 + $0x38] sm:$0xff] }
  0xd4   : > { %965 = vst.msk [vmem:[#allocation2 + $0x78] sm:$0xff] %vm299_vm1, %v949_v19  ;;  %v941_v61 = vadd.f32 %v925_v24, %v909_v0 }
  0xd5   : > { %953 = vst.msk [vmem:[#allocation2 + $0x18] sm:$0xff] %vm299_vm1, %v937_v13 }
  0xd6   : > { %957 = vst.msk [vmem:[#allocation2 + $0x38] sm:$0xff] %vm299_vm1, %v941_v61 }
  0xd9   : > { %v1040_v39 = vld [vmem:[#allocation2 + $0x30] sm:$0xff] }
  0xda   : > { %1401 = vmatmul.msk.f32.gmra.mxu1 %vm299_vm1, %v1040_v39  ;;  %v978_v11 = vld [vmem:[#allocation2 + $0x58] sm:$0xff] }
  0xdb   : > { %v997_v63 = vadd.f32 %v2018_v62, %v978_v11  ;;  %v982_v10 = vld [vmem:[#allocation2 + $0x78] sm:$0xff] }
  0xdc   : > { %v1001_v34 = vadd.f32 %v2018_v62, %v982_v10  ;;  %v970_v59 = vld [vmem:[#allocation2 + $0x18] sm:$0xff] }
  0xdd   : > { %v1013_v30 = vmax.f32 %v997_v63, 0.0  ;;  %v989_v43 = vadd.f32 %v2018_v62, %v970_v59  ;;  %v974_v23 = vld [vmem:[#allocation2 + $0x38] sm:$0xff] }
  0xde   : > { %v1017_v21 = vmax.f32 %v1001_v34, 0.0  ;;  %v993_v54 = vadd.f32 %v2018_v62, %v974_v23 }
  0xdf   : > { %1029 = vst.msk [vmem:[#allocation2 + $0x58] sm:$0xff] %vm299_vm1, %v1013_v30  ;;  %v1005_v36 = vmax.f32 %v989_v43, 0.0 }
  0xe0   : > { %1033 = vst.msk [vmem:[#allocation2 + $0x78] sm:$0xff] %vm299_vm1, %v1017_v21  ;;  %v1009_v14 = vmax.f32 %v993_v54, 0.0 }
  0xe1   : > { %1021 = vst.msk [vmem:[#allocation2 + $0x18] sm:$0xff] %vm299_vm1, %v1005_v36 }
  0xe2   : > { %1025 = vst.msk [vmem:[#allocation2 + $0x38] sm:$0xff] %vm299_vm1, %v1009_v14 }
  0xe6   : > { %v1045_v38 = vld [vmem:[#allocation2 + $0x58] sm:$0xff] }
  0xe7   : > { %1406 = vmatmul.msk.f32.gmra.mxu2 %vm299_vm1, %v1045_v38  ;;  %v1049_v40 = vld [vmem:[#allocation2 + $0x78] sm:$0xff] }
  0xe8   : > { %1410 = vmatmul.msk.f32.gmra.mxu3 %vm299_vm1, %v1049_v40  ;;  %v1037_v60 = vld [vmem:[#allocation2 + $0x18] sm:$0xff] }
  0xe9   : > { %1398 = vmatmul.msk.f32.gmra.mxu0 %vm299_vm1, %v1037_v60  ;;  %v1041_v62 = vld [vmem:[#allocation2 + $0x38] sm:$0xff] }
  0xea   : > { %1402 = vmatmul.msk.f32.gmra.mxu1 %vm299_vm1, %v1041_v62 }
  0xfe   : > { %v1124_v35 = vpop.f32.mrf.mxu0 }
  0xff   : > { %v1125_v33 = vadd.f32 %v1459_v56, %v1124_v35  ;;  %v1136_v48 = vpop.f32.mrf.mxu1 }
 0x100   : > { %v1137_v55 = vadd.f32 %v1459_v56, %v1136_v48  ;;  %v1148_v9 = vpop.f32.mrf.mxu2 }
 0x101   : > { %1173 = vst.msk [vmem:[%s2248_s7] sm:$0xff] %vm1172_vm2, %v1125_v33  ;;  %v1149_v27 = vadd.f32 %v1459_v56, %v1148_v9  ;;  %v1160_v58 = vpop.f32.mrf.mxu3 }
 0x102   : > { %1177 = vst.msk [vmem:[%s2248_s7 + $0x20] sm:$0xff] %vm1172_vm2, %v1137_v55  ;;  %v1161_v45 = vadd.f32 %v1459_v56, %v1160_v58 }
 0x103   : > { %1181 = vst.msk [vmem:[%s2248_s7 + $0x40] sm:$0xff] %vm1172_vm2, %v1149_v27 }
 0x104   : > { %1185 = vst.msk [vmem:[%s2248_s7 + $0x60] sm:$0xff] %vm1172_vm2, %v1161_v45 }
 0x108   : > { %v1127_v20 = vpop.f32.mrf.mxu0  ;;  %v1151_v4 = vpop.f32.mrf.mxu2 }
 0x109   : > { %v1128_v22 = vadd.f32 %v1459_v56, %v1127_v20  ;;  %v1152_v25 = vadd.f32 %v1459_v56, %v1151_v4  ;;  %v1163_v50 = vpop.f32.mrf.mxu3 }
 0x10a   : > { %v1164_v3 = vadd.f32 %v1459_v56, %v1163_v50 }
 0x10b   : > { %1174 = vst.msk [vmem:[%s2248_s7 + $0x8] sm:$0xff] %vm1172_vm2, %v1128_v22 }
 0x10c   : > { %v1139_v6 = vpop.f32.mrf.mxu1  ;;  %1182 = vst.msk [vmem:[%s2248_s7 + $0x48] sm:$0xff] %vm1172_vm2, %v1152_v25 }
 0x10d   : > { %v1140_v49 = vadd.f32 %v1459_v56, %v1139_v6  ;;  %1186 = vst.msk [vmem:[%s2248_s7 + $0x68] sm:$0xff] %vm1172_vm2, %v1164_v3 }
 0x10f   : > { %1178 = vst.msk [vmem:[%s2248_s7 + $0x28] sm:$0xff] %vm1172_vm2, %v1140_v49 }
 0x110   : > { %v1154_v18 = vpop.f32.mrf.mxu2 }
 0x111   : > { %v1166_v1 = vpop.f32.mrf.mxu3  ;;  %v1155_v57 = vadd.f32 %v1459_v56, %v1154_v18 }
 0x112   : > { %v1167_v29 = vadd.f32 %v1459_v56, %v1166_v1 }
 0x113   : > { %1183 = vst.msk [vmem:[%s2248_s7 + $0x50] sm:$0xff] %vm1172_vm2, %v1155_v57 }
 0x114   : > { %1187 = vst.msk [vmem:[%s2248_s7 + $0x70] sm:$0xff] %vm1172_vm2, %v1167_v29 }
 0x14c   : > { %v1130_v51 = vpop.f32.mrf.mxu0 }
 0x14d   : > { %v1131_v44 = vadd.f32 %v1459_v56, %v1130_v51 }
 0x14f   : > { %1175 = vst.msk [vmem:[%s2248_s7 + $0x10] sm:$0xff] %vm1172_vm2, %v1131_v44 }
 0x157   : > { %v1142_v41 = vpop.f32.mrf.mxu1 }
 0x158   : > { %v1143_v5 = vadd.f32 %v1459_v56, %v1142_v41 }
 0x15a   : > { %1179 = vst.msk [vmem:[%s2248_s7 + $0x30] sm:$0xff] %vm1172_vm2, %v1143_v5 }
 0x166   : > { %v1133_v53 = vpop.f32.mrf.mxu0 }
 0x167   : > { %v1134_v46 = vadd.f32 %v1459_v56, %v1133_v53  ;;  %v1145_v8 = vpop.f32.mrf.mxu1 }
 0x168   : > { %v1146_v26 = vadd.f32 %v1459_v56, %v1145_v8 }
 0x169   : > { %1176 = vst.msk [vmem:[%s2248_s7 + $0x18] sm:$0xff] %vm1172_vm2, %v1134_v46 }
 0x16a   : > { %1180 = vst.msk [vmem:[%s2248_s7 + $0x38] sm:$0xff] %vm1172_vm2, %v1146_v26  ;;  %v1157_v15 = vpop.f32.mrf.mxu2 }
 0x16b   : > { %v1158_v47 = vadd.f32 %v1459_v56, %v1157_v15  ;;  %v1169_v2 = vpop.f32.mrf.mxu3 }
 0x16c   : > { %v1170_v16 = vadd.f32 %v1459_v56, %v1169_v2 }
 0x16d   : > { %1184 = vst.msk [vmem:[%s2248_s7 + $0x58] sm:$0xff] %vm1172_vm2, %v1158_v47 }
 0x16e   : > { %1188 = vst.msk [vmem:[%s2248_s7 + $0x78] sm:$0xff] %vm1172_vm2, %v1170_v16 }
 0x16f PF: > { %s15_s22 = sadd.s32 1, %s1500_s22   ;;  %s2303_s18 = smov %s1492_s20 }
 0x170   : > { %p12_p8 = scmp.ge.s32.totalorder %s15_s22, 6   ;;  %s2304_s19 = smov %s1496_s21 }
 0x171   : > { %s2305_s20 = smov %s2308_s23  ;;  %s2306_s21 = smov %s2312_s24 }
 0x172   :  { %14 = sbr.rel (!%p12_p8) target bundleno = 3 (0x3), region = 72 }

</bundles_post_ra>
